<compile_context>
chip_gen: v7x
topology: tpu7x:2x2x1
jax: 0.10.0
libtpu: 0.0.40
codegen_flags: <defaults>
</compile_context>

<pallas_src>
import functools

import jax
import jax.numpy as jnp
from jax import lax
from jax.experimental import pallas as pl
from jax.experimental.pallas import tpu as pltpu


# ----------------------------------------------------------------------------
# Fused kernel: bidirectional GRU -> LayerNorm -> attention
# Gate order is PyTorch's [r, z, n]:
#   r = sigmoid(x Wxr + bxr + h Whr + bhr)
#   z = sigmoid(x Wxz + bxz + h Whz + bhz)
#   n = tanh   (x Wxn + bxn + r * (h Whn + bhn))
#   h = (1 - z) * n + z * h
# bg* below already contains bx (all gates) + bh (r,z gates); bhn* is the
# n-gate recurrent bias which must stay inside the r * (...) term.
# ----------------------------------------------------------------------------
def _sent_attn_kernel(x_ref,
                      wxf_ref, whf_ref, bgf_ref, bhnf_ref,
                      wxr_ref, whr_ref, bgr_ref, bhnr_ref,
                      gamma_ref, beta_ref, wa_ref, ba_ref, wc_ref, bc_ref,
                      out_ref, attn_ref,
                      gxf_scr, gxr_scr, seqf_scr, seqr_scr):
    L, N, D = x_ref.shape
    H = whf_ref.shape[0]

    # ---- hoisted input projections: one big MXU matmul per direction -------
    # bf16 operands, f32 accumulation (gate / LN / softmax math stays f32).
    x2 = x_ref[...].reshape(L * N, D).astype(jnp.bfloat16)
    gxf_scr[...] = (jnp.dot(x2, wxf_ref[...].astype(jnp.bfloat16),
                            preferred_element_type=jnp.float32)
                    + bgf_ref[...]).reshape(L, N, 3 * H)
    gxr_scr[...] = (jnp.dot(x2, wxr_ref[...].astype(jnp.bfloat16),
                            preferred_element_type=jnp.float32)
                    + bgr_ref[...]).reshape(L, N, 3 * H)

    whf = whf_ref[...]
    whr = whr_ref[...]
    bhnf = bhnf_ref[...]
    bhnr = bhnr_ref[...]

    def cell(gx, h, wh, bhn):
        # gx already contains x@Wx + bx (+ bh for the r/z gates).
        gh = jnp.dot(h, wh, preferred_element_type=jnp.float32)       # (N, 3H)
        r = jax.nn.sigmoid(gx[:, 0:H] + gh[:, 0:H])
        z = jax.nn.sigmoid(gx[:, H:2 * H] + gh[:, H:2 * H])
        n = jnp.tanh(gx[:, 2 * H:3 * H] + r * (gh[:, 2 * H:3 * H] + bhn))
        return (1.0 - z) * n + z * h

    def body(t, carry):
        h_f, h_r = carry
        # forward direction
        h_f = cell(gxf_scr[t], h_f, whf, bhnf)
        seqf_scr[t] = h_f
        # reverse direction
        idx = L - 1 - t
        h_r = cell(gxr_scr[idx], h_r, whr, bhnr)
        seqr_scr[idx] = h_r
        return (h_f, h_r)

    h0 = jnp.zeros((N, H), jnp.float32)
    lax.fori_loop(0, L, body, (h0, h0), unroll=True)   # short loop: full unroll

    # ---- LayerNorm over the concatenated (2H) feature dim ------------------
    hcat = jnp.concatenate([seqf_scr[...], seqr_scr[...]], axis=-1)    # (L,N,2H)
    mu = jnp.mean(hcat, axis=-1, keepdims=True)
    var = jnp.mean(jnp.square(hcat - mu), axis=-1, keepdims=True)
    y = (hcat - mu) * lax.rsqrt(var + 1e-5)
    y = y * gamma_ref[...] + beta_ref[...]

    # ---- attention: tanh(Linear) -> context score -> softmax over axis 1 ---
    D2 = 2 * H
    Ho = wa_ref.shape[1]
    y2 = y.reshape(L * N, D2)
    a = jnp.tanh(jnp.dot(y2, wa_ref[...], preferred_element_type=jnp.float32)
                 + ba_ref[...])                                        # (L*N, Ho)
    scores = jnp.sum(a.reshape(L, N, Ho) * wc_ref[...], axis=-1) + bc_ref[...]
    m = jnp.max(scores, axis=1, keepdims=True)
    e = jnp.exp(scores - m)
    p = e * pl.reciprocal(jnp.sum(e, axis=1, keepdims=True), approx=True)

    out_ref[...] = jnp.sum(y * p[:, :, None], axis=1)                  # (L, 2H)
    attn_ref[...] = p                                                  # (L, N)


# ----------------------------------------------------------------------------
# Wrapper
# ----------------------------------------------------------------------------
def sent_attn_net_forward(params, words_embed):
    """words_embed: (b, s, 2*word_dims) -> (sents_embed (b, 2*sent_dims), attn (b, s))."""
    L, N, D = words_embed.shape
    g = params["gru"]
    H = g["whf"].shape[0]

    # Rough VMEM footprint -> explicit limit (don't rely on the scoped
    # default of 16/32 MiB; physical is 128 MiB v5e/v6e, 64 MiB v7x).
    est = 4 * (L * N * (D + 8 * H)                       # input + scratch
               + 2 * 3 * H * (D + H) + 2 * H * H         # weights
               + L * (2 * H + N))                        # outputs
    vmem_limit = int(min(64 * 1024 * 1024, max(4 * 1024 * 1024, 8 * est)))

    out, attn = pl.pallas_call(
        _sent_attn_kernel,
        out_shape=(jax.ShapeDtypeStruct((L, 2 * H), jnp.float32),
                   jax.ShapeDtypeStruct((L, N), jnp.float32)),
        scratch_shapes=[pltpu.VMEM((L, N, 3 * H), jnp.float32),   # hoisted gx fwd
                        pltpu.VMEM((L, N, 3 * H), jnp.float32),   # hoisted gx rev
                        pltpu.VMEM((L, N, H), jnp.float32),       # fwd hidden seq
                        pltpu.VMEM((L, N, H), jnp.float32)],      # rev hidden seq
        compiler_params=pltpu.CompilerParams(vmem_limit_bytes=vmem_limit),
    )(words_embed,
      g["wxf"], g["whf"], g["bgf"], g["bhnf"],
      g["wxr"], g["whr"], g["bgr"], g["bhnr"],
      params["gamma"], params["beta"],
      params["wa"], params["ba"], params["wc"], params["bc"])
    return out, attn


# ----------------------------------------------------------------------------
# Parameter construction (deterministic, synthetic)
# ----------------------------------------------------------------------------
def _rnd(key, shape, scale=0.1):
    return (scale * jax.random.normal(key, shape)).astype(jnp.float32)


def _gru_dir_params(key, d_in, h, suffix):
    ks = jax.random.split(key, 4)
    wx = _rnd(ks[0], (d_in, 3 * h))
    wh = _rnd(ks[1], (h, 3 * h))
    bx = _rnd(ks[2], (3 * h,))
    bh = _rnd(ks[3], (3 * h,))
    # Pre-merge biases: r/z gates fold bx + bh into the hoisted projection;
    # the n gate keeps bh separate because it is scaled by r.
    bg = (bx + jnp.concatenate([bh[:2 * h], jnp.zeros((h,), jnp.float32)])
          ).reshape(1, 3 * h)
    bhn = bh[2 * h:].reshape(1, h)
    return {"wx" + suffix: wx, "wh" + suffix: wh,
            "bg" + suffix: bg, "bhn" + suffix: bhn}


def init_params(key, word_dims, sent_dims):
    d_in = 2 * word_dims
    h = sent_dims
    ks = jax.random.split(key, 6)
    gru = {}
    gru.update(_gru_dir_params(ks[0], d_in, h, "f"))
    gru.update(_gru_dir_params(ks[1], d_in, h, "r"))
    return dict(
        gru=gru,
        gamma=jnp.ones((1, 2 * h), jnp.float32),   # nn.LayerNorm default init
        beta=jnp.zeros((1, 2 * h), jnp.float32),
        wa=_rnd(ks[2], (2 * h, h)), ba=_rnd(ks[3], (1, h)),
        wc=_rnd(ks[4], (1, h)), bc=_rnd(ks[5], (1, 1)),
    )


if __name__ == "__main__":
    word_dims, sent_dims = 16, 32       # GRU input = 2*word_dims = 32, hidden = 32
    b, s = 4, 8                         # words_embed: (b, s, 2*word_dims)

    key = jax.random.PRNGKey(0)
    params = init_params(key, word_dims, sent_dims)
    words_embed = (0.5 * jax.random.normal(
        jax.random.fold_in(key, 123), (b, s, 2 * word_dims))).astype(jnp.float32)

    fwd = jax.jit(functools.partial(sent_attn_net_forward, params))
    sents_embed, sents_attn = fwd(words_embed)
    jax.block_until_ready((sents_embed, sents_attn))

    assert sents_embed.shape == (b, 2 * sent_dims)
    assert sents_attn.shape == (b, s)
    assert bool(jnp.all(jnp.isfinite(sents_embed)))
    assert bool(jnp.all(jnp.isfinite(sents_attn)))
    # attention rows are a softmax over dim 1 -> must sum to ~1
    assert bool(jnp.all(jnp.abs(jnp.sum(sents_attn, axis=1) - 1.0) < 1e-2))
    print("KERNEL_OK")
</pallas_src>

<mosaic_0001>
module attributes {stable_mosaic.version = 11 : i64} {
  func.func @_sent_attn_kernel(%arg0: memref<4x8x32xf32, #tpu.memory_space<vmem>>, %arg1: memref<32x96xf32, #tpu.memory_space<vmem>>, %arg2: memref<32x96xf32, #tpu.memory_space<vmem>>, %arg3: memref<1x96xf32, #tpu.memory_space<vmem>>, %arg4: memref<1x32xf32, #tpu.memory_space<vmem>>, %arg5: memref<32x96xf32, #tpu.memory_space<vmem>>, %arg6: memref<32x96xf32, #tpu.memory_space<vmem>>, %arg7: memref<1x96xf32, #tpu.memory_space<vmem>>, %arg8: memref<1x32xf32, #tpu.memory_space<vmem>>, %arg9: memref<1x64xf32, #tpu.memory_space<vmem>>, %arg10: memref<1x64xf32, #tpu.memory_space<vmem>>, %arg11: memref<64x32xf32, #tpu.memory_space<vmem>>, %arg12: memref<1x32xf32, #tpu.memory_space<vmem>>, %arg13: memref<1x32xf32, #tpu.memory_space<vmem>>, %arg14: memref<1x1xf32, #tpu.memory_space<vmem>>, %arg15: memref<4x64xf32, #tpu.memory_space<vmem>>, %arg16: memref<4x8xf32, #tpu.memory_space<vmem>>, %arg17: memref<4x8x96xf32, #tpu.memory_space<vmem>>, %arg18: memref<4x8x96xf32, #tpu.memory_space<vmem>>, %arg19: memref<4x8x32xf32, #tpu.memory_space<vmem>>, %arg20: memref<4x8x32xf32, #tpu.memory_space<vmem>>) attributes {dimension_semantics = [], scalar_prefetch = 0 : i64, scratch_operands = 4 : i64, tpu.core_type = #tpu.core_type<tc>} {
    %c0 = arith.constant 0 : index
    %c0_0 = arith.constant 0 : index
    %c0_1 = arith.constant 0 : index
    %0 = vector.load %arg0[%c0, %c0_0, %c0_1] : memref<4x8x32xf32, #tpu.memory_space<vmem>>, vector<4x8x32xf32>
    %1 = vector.shape_cast %0 : vector<4x8x32xf32> to vector<32x32xf32>
    %2 = arith.truncf %1 : vector<32x32xf32> to vector<32x32xbf16>
    %c0_2 = arith.constant 0 : index
    %c0_3 = arith.constant 0 : index
    %3 = vector.load %arg1[%c0_2, %c0_3] : memref<32x96xf32, #tpu.memory_space<vmem>>, vector<32x96xf32>
    %4 = arith.truncf %3 : vector<32x96xf32> to vector<32x96xbf16>
    %cst = arith.constant dense<0.000000e+00> : vector<32x96xf32>
    %5 = tpu.matmul %2, %4, %cst {dimension_numbers = #tpu.dot_dimension_numbers<[1], [0], [0], [1], [0, 0, 1, 1], [], []>} : vector<32x32xbf16>, vector<32x96xbf16>, vector<32x96xf32> -> vector<32x96xf32>
    %c0_4 = arith.constant 0 : index
    %c0_5 = arith.constant 0 : index
    %6 = vector.load %arg3[%c0_4, %c0_5] : memref<1x96xf32, #tpu.memory_space<vmem>>, vector<1x96xf32>
    %7 = vector.broadcast %6 : vector<1x96xf32> to vector<32x96xf32>
    %8 = arith.addf %5, %7 : vector<32x96xf32>
    %9 = vector.shape_cast %8 : vector<32x96xf32> to vector<4x8x96xf32>
    %c0_6 = arith.constant 0 : index
    %c0_7 = arith.constant 0 : index
    %c0_8 = arith.constant 0 : index
    %10 = vector.load %arg17[%c0_6, %c0_7, %c0_8] : memref<4x8x96xf32, #tpu.memory_space<vmem>>, vector<4x8x96xf32>
    tpu.vector_store %arg17[%c0_6, %c0_7, %c0_8], %9 {strides = array<i32>} : memref<4x8x96xf32, #tpu.memory_space<vmem>>, vector<4x8x96xf32>,
    %c0_9 = arith.constant 0 : index
    %c0_10 = arith.constant 0 : index
    %11 = vector.load %arg5[%c0_9, %c0_10] : memref<32x96xf32, #tpu.memory_space<vmem>>, vector<32x96xf32>
    %12 = arith.truncf %11 : vector<32x96xf32> to vector<32x96xbf16>
    %cst_11 = arith.constant dense<0.000000e+00> : vector<32x96xf32>
    %13 = tpu.matmul %2, %12, %cst_11 {dimension_numbers = #tpu.dot_dimension_numbers<[1], [0], [0], [1], [0, 0, 1, 1], [], []>} : vector<32x32xbf16>, vector<32x96xbf16>, vector<32x96xf32> -> vector<32x96xf32>
    %c0_12 = arith.constant 0 : index
    %c0_13 = arith.constant 0 : index
    %14 = vector.load %arg7[%c0_12, %c0_13] : memref<1x96xf32, #tpu.memory_space<vmem>>, vector<1x96xf32>
    %15 = vector.broadcast %14 : vector<1x96xf32> to vector<32x96xf32>
    %16 = arith.addf %13, %15 : vector<32x96xf32>
    %17 = vector.shape_cast %16 : vector<32x96xf32> to vector<4x8x96xf32>
    %c0_14 = arith.constant 0 : index
    %c0_15 = arith.constant 0 : index
    %c0_16 = arith.constant 0 : index
    %18 = vector.load %arg18[%c0_14, %c0_15, %c0_16] : memref<4x8x96xf32, #tpu.memory_space<vmem>>, vector<4x8x96xf32>
    tpu.vector_store %arg18[%c0_14, %c0_15, %c0_16], %17 {strides = array<i32>} : memref<4x8x96xf32, #tpu.memory_space<vmem>>, vector<4x8x96xf32>,
    %c0_17 = arith.constant 0 : index
    %c0_18 = arith.constant 0 : index
    %19 = vector.load %arg2[%c0_17, %c0_18] : memref<32x96xf32, #tpu.memory_space<vmem>>, vector<32x96xf32>
    %c0_19 = arith.constant 0 : index
    %c0_20 = arith.constant 0 : index
    %20 = vector.load %arg6[%c0_19, %c0_20] : memref<32x96xf32, #tpu.memory_space<vmem>>, vector<32x96xf32>
    %c0_21 = arith.constant 0 : index
    %c0_22 = arith.constant 0 : index
    %21 = vector.load %arg4[%c0_21, %c0_22] : memref<1x32xf32, #tpu.memory_space<vmem>>, vector<1x32xf32>
    %c0_23 = arith.constant 0 : index
    %c0_24 = arith.constant 0 : index
    %22 = vector.load %arg8[%c0_23, %c0_24] : memref<1x32xf32, #tpu.memory_space<vmem>>, vector<1x32xf32>
    %cst_25 = arith.constant 0.000000e+00 : f32
    %23 = vector.broadcast %cst_25 : f32 to vector<8x32xf32>
    %c0_i32 = arith.constant 0 : i32
    %24 = arith.index_cast %c0_i32 : i32 to index
    %c0_26 = arith.constant 0 : index
    %c0_27 = arith.constant 0 : index
    %25 = vector.load %arg17[%24, %c0_26, %c0_27] : memref<4x8x96xf32, #tpu.memory_space<vmem>>, vector<1x8x96xf32>
    %26 = vector.shape_cast %25 : vector<1x8x96xf32> to vector<8x96xf32>
    %cst_28 = arith.constant dense<0.000000e+00> : vector<8x96xf32>
    %27 = tpu.matmul %23, %19, %cst_28 {dimension_numbers = #tpu.dot_dimension_numbers<[1], [0], [0], [1], [0, 0, 1, 1], [], []>} : vector<8x32xf32>, vector<32x96xf32>, vector<8x96xf32> -> vector<8x96xf32>
    %28 = vector.extract_strided_slice %26 {offsets = [0, 0], sizes = [8, 32], strides = [1, 1]} : vector<8x96xf32> to vector<8x32xf32>
    %29 = vector.extract_strided_slice %27 {offsets = [0, 0], sizes = [8, 32], strides = [1, 1]} : vector<8x96xf32> to vector<8x32xf32>
    %30 = arith.addf %28, %29 : vector<8x32xf32>
    %31 = arith.negf %30 : vector<8x32xf32>
    %32 = math.exp %31 : vector<8x32xf32>
    %cst_29 = arith.constant 1.000000e+00 : f32
    %33 = vector.broadcast %cst_29 : f32 to vector<8x32xf32>
    %34 = arith.addf %33, %32 : vector<8x32xf32>
    %35 = arith.divf %33, %34 : vector<8x32xf32>
    %36 = vector.extract_strided_slice %26 {offsets = [0, 32], sizes = [8, 32], strides = [1, 1]} : vector<8x96xf32> to vector<8x32xf32>
    %37 = vector.extract_strided_slice %27 {offsets = [0, 32], sizes = [8, 32], strides = [1, 1]} : vector<8x96xf32> to vector<8x32xf32>
    %38 = arith.addf %36, %37 : vector<8x32xf32>
    %39 = arith.negf %38 : vector<8x32xf32>
    %40 = math.exp %39 : vector<8x32xf32>
    %cst_30 = arith.constant 1.000000e+00 : f32
    %41 = vector.broadcast %cst_30 : f32 to vector<8x32xf32>
    %42 = arith.addf %41, %40 : vector<8x32xf32>
    %43 = arith.divf %41, %42 : vector<8x32xf32>
    %44 = vector.extract_strided_slice %26 {offsets = [0, 64], sizes = [8, 32], strides = [1, 1]} : vector<8x96xf32> to vector<8x32xf32>
    %45 = vector.extract_strided_slice %27 {offsets = [0, 64], sizes = [8, 32], strides = [1, 1]} : vector<8x96xf32> to vector<8x32xf32>
    %46 = vector.broadcast %21 : vector<1x32xf32> to vector<8x32xf32>
    %47 = arith.addf %45, %46 : vector<8x32xf32>
    %48 = arith.mulf %35, %47 : vector<8x32xf32>
    %49 = arith.addf %44, %48 : vector<8x32xf32>
    %50 = math.tanh %49 : vector<8x32xf32>
    %cst_31 = arith.constant 1.000000e+00 : f32
    %51 = vector.broadcast %cst_31 : f32 to vector<8x32xf32>
    %52 = arith.subf %51, %43 : vector<8x32xf32>
    %53 = arith.mulf %52, %50 : vector<8x32xf32>
    %54 = arith.mulf %43, %23 : vector<8x32xf32>
    %55 = arith.addf %53, %54 : vector<8x32xf32>
    %56 = arith.index_cast %c0_i32 : i32 to index
    %c0_32 = arith.constant 0 : index
    %c0_33 = arith.constant 0 : index
    %57 = vector.load %arg19[%56, %c0_32, %c0_33] : memref<4x8x32xf32, #tpu.memory_space<vmem>>, vector<1x8x32xf32>
    %58 = vector.shape_cast %57 : vector<1x8x32xf32> to vector<8x32xf32>
    %59 = vector.shape_cast %55 : vector<8x32xf32> to vector<1x8x32xf32>
    tpu.vector_store %arg19[%56, %c0_32, %c0_33], %59 {strides = array<i32>} : memref<4x8x32xf32, #tpu.memory_space<vmem>>, vector<1x8x32xf32>,
    %c3_i32 = arith.constant 3 : i32
    %60 = arith.subi %c3_i32, %c0_i32 : i32
    %61 = arith.index_cast %60 : i32 to index
    %c0_34 = arith.constant 0 : index
    %c0_35 = arith.constant 0 : index
    %62 = vector.load %arg18[%61, %c0_34, %c0_35] : memref<4x8x96xf32, #tpu.memory_space<vmem>>, vector<1x8x96xf32>
    %63 = vector.shape_cast %62 : vector<1x8x96xf32> to vector<8x96xf32>
    %cst_36 = arith.constant dense<0.000000e+00> : vector<8x96xf32>
    %64 = tpu.matmul %23, %20, %cst_36 {dimension_numbers = #tpu.dot_dimension_numbers<[1], [0], [0], [1], [0, 0, 1, 1], [], []>} : vector<8x32xf32>, vector<32x96xf32>, vector<8x96xf32> -> vector<8x96xf32>
    %65 = vector.extract_strided_slice %63 {offsets = [0, 0], sizes = [8, 32], strides = [1, 1]} : vector<8x96xf32> to vector<8x32xf32>
    %66 = vector.extract_strided_slice %64 {offsets = [0, 0], sizes = [8, 32], strides = [1, 1]} : vector<8x96xf32> to vector<8x32xf32>
    %67 = arith.addf %65, %66 : vector<8x32xf32>
    %68 = arith.negf %67 : vector<8x32xf32>
    %69 = math.exp %68 : vector<8x32xf32>
    %cst_37 = arith.constant 1.000000e+00 : f32
    %70 = vector.broadcast %cst_37 : f32 to vector<8x32xf32>
    %71 = arith.addf %70, %69 : vector<8x32xf32>
    %72 = arith.divf %70, %71 : vector<8x32xf32>
    %73 = vector.extract_strided_slice %63 {offsets = [0, 32], sizes = [8, 32], strides = [1, 1]} : vector<8x96xf32> to vector<8x32xf32>
    %74 = vector.extract_strided_slice %64 {offsets = [0, 32], sizes = [8, 32], strides = [1, 1]} : vector<8x96xf32> to vector<8x32xf32>
    %75 = arith.addf %73, %74 : vector<8x32xf32>
    %76 = arith.negf %75 : vector<8x32xf32>
    %77 = math.exp %76 : vector<8x32xf32>
    %cst_38 = arith.constant 1.000000e+00 : f32
    %78 = vector.broadcast %cst_38 : f32 to vector<8x32xf32>
    %79 = arith.addf %78, %77 : vector<8x32xf32>
    %80 = arith.divf %78, %79 : vector<8x32xf32>
    %81 = vector.extract_strided_slice %63 {offsets = [0, 64], sizes = [8, 32], strides = [1, 1]} : vector<8x96xf32> to vector<8x32xf32>
    %82 = vector.extract_strided_slice %64 {offsets = [0, 64], sizes = [8, 32], strides = [1, 1]} : vector<8x96xf32> to vector<8x32xf32>
    %83 = vector.broadcast %22 : vector<1x32xf32> to vector<8x32xf32>
    %84 = arith.addf %82, %83 : vector<8x32xf32>
    %85 = arith.mulf %72, %84 : vector<8x32xf32>
    %86 = arith.addf %81, %85 : vector<8x32xf32>
    %87 = math.tanh %86 : vector<8x32xf32>
    %cst_39 = arith.constant 1.000000e+00 : f32
    %88 = vector.broadcast %cst_39 : f32 to vector<8x32xf32>
    %89 = arith.subf %88, %80 : vector<8x32xf32>
    %90 = arith.mulf %89, %87 : vector<8x32xf32>
    %91 = arith.mulf %80, %23 : vector<8x32xf32>
    %92 = arith.addf %90, %91 : vector<8x32xf32>
    %93 = arith.index_cast %60 : i32 to index
    %c0_40 = arith.constant 0 : index
    %c0_41 = arith.constant 0 : index
    %94 = vector.load %arg20[%93, %c0_40, %c0_41] : memref<4x8x32xf32, #tpu.memory_space<vmem>>, vector<1x8x32xf32>
    %95 = vector.shape_cast %94 : vector<1x8x32xf32> to vector<8x32xf32>
    %96 = vector.shape_cast %92 : vector<8x32xf32> to vector<1x8x32xf32>
    tpu.vector_store %arg20[%93, %c0_40, %c0_41], %96 {strides = array<i32>} : memref<4x8x32xf32, #tpu.memory_space<vmem>>, vector<1x8x32xf32>,
    %c1_i32 = arith.constant 1 : i32
    %97 = arith.index_cast %c1_i32 : i32 to index
    %c0_42 = arith.constant 0 : index
    %c0_43 = arith.constant 0 : index
    %98 = vector.load %arg17[%97, %c0_42, %c0_43] : memref<4x8x96xf32, #tpu.memory_space<vmem>>, vector<1x8x96xf32>
    %99 = vector.shape_cast %98 : vector<1x8x96xf32> to vector<8x96xf32>
    %cst_44 = arith.constant dense<0.000000e+00> : vector<8x96xf32>
    %100 = tpu.matmul %55, %19, %cst_44 {dimension_numbers = #tpu.dot_dimension_numbers<[1], [0], [0], [1], [0, 0, 1, 1], [], []>} : vector<8x32xf32>, vector<32x96xf32>, vector<8x96xf32> -> vector<8x96xf32>
    %101 = vector.extract_strided_slice %99 {offsets = [0, 0], sizes = [8, 32], strides = [1, 1]} : vector<8x96xf32> to vector<8x32xf32>
    %102 = vector.extract_strided_slice %100 {offsets = [0, 0], sizes = [8, 32], strides = [1, 1]} : vector<8x96xf32> to vector<8x32xf32>
    %103 = arith.addf %101, %102 : vector<8x32xf32>
    %104 = arith.negf %103 : vector<8x32xf32>
    %105 = math.exp %104 : vector<8x32xf32>
    %cst_45 = arith.constant 1.000000e+00 : f32
    %106 = vector.broadcast %cst_45 : f32 to vector<8x32xf32>
    %107 = arith.addf %106, %105 : vector<8x32xf32>
    %108 = arith.divf %106, %107 : vector<8x32xf32>
    %109 = vector.extract_strided_slice %99 {offsets = [0, 32], sizes = [8, 32], strides = [1, 1]} : vector<8x96xf32> to vector<8x32xf32>
    %110 = vector.extract_strided_slice %100 {offsets = [0, 32], sizes = [8, 32], strides = [1, 1]} : vector<8x96xf32> to vector<8x32xf32>
    %111 = arith.addf %109, %110 : vector<8x32xf32>
    %112 = arith.negf %111 : vector<8x32xf32>
    %113 = math.exp %112 : vector<8x32xf32>
    %cst_46 = arith.constant 1.000000e+00 : f32
    %114 = vector.broadcast %cst_46 : f32 to vector<8x32xf32>
    %115 = arith.addf %114, %113 : vector<8x32xf32>
    %116 = arith.divf %114, %115 : vector<8x32xf32>
    %117 = vector.extract_strided_slice %99 {offsets = [0, 64], sizes = [8, 32], strides = [1, 1]} : vector<8x96xf32> to vector<8x32xf32>
    %118 = vector.extract_strided_slice %100 {offsets = [0, 64], sizes = [8, 32], strides = [1, 1]} : vector<8x96xf32> to vector<8x32xf32>
    %119 = vector.broadcast %21 : vector<1x32xf32> to vector<8x32xf32>
    %120 = arith.addf %118, %119 : vector<8x32xf32>
    %121 = arith.mulf %108, %120 : vector<8x32xf32>
    %122 = arith.addf %117, %121 : vector<8x32xf32>
    %123 = math.tanh %122 : vector<8x32xf32>
    %cst_47 = arith.constant 1.000000e+00 : f32
    %124 = vector.broadcast %cst_47 : f32 to vector<8x32xf32>
    %125 = arith.subf %124, %116 : vector<8x32xf32>
    %126 = arith.mulf %125, %123 : vector<8x32xf32>
    %127 = arith.mulf %116, %55 : vector<8x32xf32>
    %128 = arith.addf %126, %127 : vector<8x32xf32>
    %129 = arith.index_cast %c1_i32 : i32 to index
    %c0_48 = arith.constant 0 : index
    %c0_49 = arith.constant 0 : index
    %130 = vector.load %arg19[%129, %c0_48, %c0_49] : memref<4x8x32xf32, #tpu.memory_space<vmem>>, vector<1x8x32xf32>
    %131 = vector.shape_cast %130 : vector<1x8x32xf32> to vector<8x32xf32>
    %132 = vector.shape_cast %128 : vector<8x32xf32> to vector<1x8x32xf32>
    tpu.vector_store %arg19[%129, %c0_48, %c0_49], %132 {strides = array<i32>} : memref<4x8x32xf32, #tpu.memory_space<vmem>>, vector<1x8x32xf32>,
    %c3_i32_50 = arith.constant 3 : i32
    %133 = arith.subi %c3_i32_50, %c1_i32 : i32
    %134 = arith.index_cast %133 : i32 to index
    %c0_51 = arith.constant 0 : index
    %c0_52 = arith.constant 0 : index
    %135 = vector.load %arg18[%134, %c0_51, %c0_52] : memref<4x8x96xf32, #tpu.memory_space<vmem>>, vector<1x8x96xf32>
    %136 = vector.shape_cast %135 : vector<1x8x96xf32> to vector<8x96xf32>
    %cst_53 = arith.constant dense<0.000000e+00> : vector<8x96xf32>
    %137 = tpu.matmul %92, %20, %cst_53 {dimension_numbers = #tpu.dot_dimension_numbers<[1], [0], [0], [1], [0, 0, 1, 1], [], []>} : vector<8x32xf32>, vector<32x96xf32>, vector<8x96xf32> -> vector<8x96xf32>
    %138 = vector.extract_strided_slice %136 {offsets = [0, 0], sizes = [8, 32], strides = [1, 1]} : vector<8x96xf32> to vector<8x32xf32>
    %139 = vector.extract_strided_slice %137 {offsets = [0, 0], sizes = [8, 32], strides = [1, 1]} : vector<8x96xf32> to vector<8x32xf32>
    %140 = arith.addf %138, %139 : vector<8x32xf32>
    %141 = arith.negf %140 : vector<8x32xf32>
    %142 = math.exp %141 : vector<8x32xf32>
    %cst_54 = arith.constant 1.000000e+00 : f32
    %143 = vector.broadcast %cst_54 : f32 to vector<8x32xf32>
    %144 = arith.addf %143, %142 : vector<8x32xf32>
    %145 = arith.divf %143, %144 : vector<8x32xf32>
    %146 = vector.extract_strided_slice %136 {offsets = [0, 32], sizes = [8, 32], strides = [1, 1]} : vector<8x96xf32> to vector<8x32xf32>
    %147 = vector.extract_strided_slice %137 {offsets = [0, 32], sizes = [8, 32], strides = [1, 1]} : vector<8x96xf32> to vector<8x32xf32>
    %148 = arith.addf %146, %147 : vector<8x32xf32>
    %149 = arith.negf %148 : vector<8x32xf32>
    %150 = math.exp %149 : vector<8x32xf32>
    %cst_55 = arith.constant 1.000000e+00 : f32
    %151 = vector.broadcast %cst_55 : f32 to vector<8x32xf32>
    %152 = arith.addf %151, %150 : vector<8x32xf32>
    %153 = arith.divf %151, %152 : vector<8x32xf32>
    %154 = vector.extract_strided_slice %136 {offsets = [0, 64], sizes = [8, 32], strides = [1, 1]} : vector<8x96xf32> to vector<8x32xf32>
    %155 = vector.extract_strided_slice %137 {offsets = [0, 64], sizes = [8, 32], strides = [1, 1]} : vector<8x96xf32> to vector<8x32xf32>
    %156 = vector.broadcast %22 : vector<1x32xf32> to vector<8x32xf32>
    %157 = arith.addf %155, %156 : vector<8x32xf32>
    %158 = arith.mulf %145, %157 : vector<8x32xf32>
    %159 = arith.addf %154, %158 : vector<8x32xf32>
    %160 = math.tanh %159 : vector<8x32xf32>
    %cst_56 = arith.constant 1.000000e+00 : f32
    %161 = vector.broadcast %cst_56 : f32 to vector<8x32xf32>
    %162 = arith.subf %161, %153 : vector<8x32xf32>
    %163 = arith.mulf %162, %160 : vector<8x32xf32>
    %164 = arith.mulf %153, %92 : vector<8x32xf32>
    %165 = arith.addf %163, %164 : vector<8x32xf32>
    %166 = arith.index_cast %133 : i32 to index
    %c0_57 = arith.constant 0 : index
    %c0_58 = arith.constant 0 : index
    %167 = vector.load %arg20[%166, %c0_57, %c0_58] : memref<4x8x32xf32, #tpu.memory_space<vmem>>, vector<1x8x32xf32>
    %168 = vector.shape_cast %167 : vector<1x8x32xf32> to vector<8x32xf32>
    %169 = vector.shape_cast %165 : vector<8x32xf32> to vector<1x8x32xf32>
    tpu.vector_store %arg20[%166, %c0_57, %c0_58], %169 {strides = array<i32>} : memref<4x8x32xf32, #tpu.memory_space<vmem>>, vector<1x8x32xf32>,
    %c2_i32 = arith.constant 2 : i32
    %170 = arith.index_cast %c2_i32 : i32 to index
    %c0_59 = arith.constant 0 : index
    %c0_60 = arith.constant 0 : index
    %171 = vector.load %arg17[%170, %c0_59, %c0_60] : memref<4x8x96xf32, #tpu.memory_space<vmem>>, vector<1x8x96xf32>
    %172 = vector.shape_cast %171 : vector<1x8x96xf32> to vector<8x96xf32>
    %cst_61 = arith.constant dense<0.000000e+00> : vector<8x96xf32>
    %173 = tpu.matmul %128, %19, %cst_61 {dimension_numbers = #tpu.dot_dimension_numbers<[1], [0], [0], [1], [0, 0, 1, 1], [], []>} : vector<8x32xf32>, vector<32x96xf32>, vector<8x96xf32> -> vector<8x96xf32>
    %174 = vector.extract_strided_slice %172 {offsets = [0, 0], sizes = [8, 32], strides = [1, 1]} : vector<8x96xf32> to vector<8x32xf32>
    %175 = vector.extract_strided_slice %173 {offsets = [0, 0], sizes = [8, 32], strides = [1, 1]} : vector<8x96xf32> to vector<8x32xf32>
    %176 = arith.addf %174, %175 : vector<8x32xf32>
    %177 = arith.negf %176 : vector<8x32xf32>
    %178 = math.exp %177 : vector<8x32xf32>
    %cst_62 = arith.constant 1.000000e+00 : f32
    %179 = vector.broadcast %cst_62 : f32 to vector<8x32xf32>
    %180 = arith.addf %179, %178 : vector<8x32xf32>
    %181 = arith.divf %179, %180 : vector<8x32xf32>
    %182 = vector.extract_strided_slice %172 {offsets = [0, 32], sizes = [8, 32], strides = [1, 1]} : vector<8x96xf32> to vector<8x32xf32>
    %183 = vector.extract_strided_slice %173 {offsets = [0, 32], sizes = [8, 32], strides = [1, 1]} : vector<8x96xf32> to vector<8x32xf32>
    %184 = arith.addf %182, %183 : vector<8x32xf32>
    %185 = arith.negf %184 : vector<8x32xf32>
    %186 = math.exp %185 : vector<8x32xf32>
    %cst_63 = arith.constant 1.000000e+00 : f32
    %187 = vector.broadcast %cst_63 : f32 to vector<8x32xf32>
    %188 = arith.addf %187, %186 : vector<8x32xf32>
    %189 = arith.divf %187, %188 : vector<8x32xf32>
    %190 = vector.extract_strided_slice %172 {offsets = [0, 64], sizes = [8, 32], strides = [1, 1]} : vector<8x96xf32> to vector<8x32xf32>
    %191 = vector.extract_strided_slice %173 {offsets = [0, 64], sizes = [8, 32], strides = [1, 1]} : vector<8x96xf32> to vector<8x32xf32>
    %192 = vector.broadcast %21 : vector<1x32xf32> to vector<8x32xf32>
    %193 = arith.addf %191, %192 : vector<8x32xf32>
    %194 = arith.mulf %181, %193 : vector<8x32xf32>
    %195 = arith.addf %190, %194 : vector<8x32xf32>
    %196 = math.tanh %195 : vector<8x32xf32>
    %cst_64 = arith.constant 1.000000e+00 : f32
    %197 = vector.broadcast %cst_64 : f32 to vector<8x32xf32>
    %198 = arith.subf %197, %189 : vector<8x32xf32>
    %199 = arith.mulf %198, %196 : vector<8x32xf32>
    %200 = arith.mulf %189, %128 : vector<8x32xf32>
    %201 = arith.addf %199, %200 : vector<8x32xf32>
    %202 = arith.index_cast %c2_i32 : i32 to index
    %c0_65 = arith.constant 0 : index
    %c0_66 = arith.constant 0 : index
    %203 = vector.load %arg19[%202, %c0_65, %c0_66] : memref<4x8x32xf32, #tpu.memory_space<vmem>>, vector<1x8x32xf32>
    %204 = vector.shape_cast %203 : vector<1x8x32xf32> to vector<8x32xf32>
    %205 = vector.shape_cast %201 : vector<8x32xf32> to vector<1x8x32xf32>
    tpu.vector_store %arg19[%202, %c0_65, %c0_66], %205 {strides = array<i32>} : memref<4x8x32xf32, #tpu.memory_space<vmem>>, vector<1x8x32xf32>,
    %c3_i32_67 = arith.constant 3 : i32
    %206 = arith.subi %c3_i32_67, %c2_i32 : i32
    %207 = arith.index_cast %206 : i32 to index
    %c0_68 = arith.constant 0 : index
    %c0_69 = arith.constant 0 : index
    %208 = vector.load %arg18[%207, %c0_68, %c0_69] : memref<4x8x96xf32, #tpu.memory_space<vmem>>, vector<1x8x96xf32>
    %209 = vector.shape_cast %208 : vector<1x8x96xf32> to vector<8x96xf32>
    %cst_70 = arith.constant dense<0.000000e+00> : vector<8x96xf32>
    %210 = tpu.matmul %165, %20, %cst_70 {dimension_numbers = #tpu.dot_dimension_numbers<[1], [0], [0], [1], [0, 0, 1, 1], [], []>} : vector<8x32xf32>, vector<32x96xf32>, vector<8x96xf32> -> vector<8x96xf32>
    %211 = vector.extract_strided_slice %209 {offsets = [0, 0], sizes = [8, 32], strides = [1, 1]} : vector<8x96xf32> to vector<8x32xf32>
    %212 = vector.extract_strided_slice %210 {offsets = [0, 0], sizes = [8, 32], strides = [1, 1]} : vector<8x96xf32> to vector<8x32xf32>
    %213 = arith.addf %211, %212 : vector<8x32xf32>
    %214 = arith.negf %213 : vector<8x32xf32>
    %215 = math.exp %214 : vector<8x32xf32>
    %cst_71 = arith.constant 1.000000e+00 : f32
    %216 = vector.broadcast %cst_71 : f32 to vector<8x32xf32>
    %217 = arith.addf %216, %215 : vector<8x32xf32>
    %218 = arith.divf %216, %217 : vector<8x32xf32>
    %219 = vector.extract_strided_slice %209 {offsets = [0, 32], sizes = [8, 32], strides = [1, 1]} : vector<8x96xf32> to vector<8x32xf32>
    %220 = vector.extract_strided_slice %210 {offsets = [0, 32], sizes = [8, 32], strides = [1, 1]} : vector<8x96xf32> to vector<8x32xf32>
    %221 = arith.addf %219, %220 : vector<8x32xf32>
    %222 = arith.negf %221 : vector<8x32xf32>
    %223 = math.exp %222 : vector<8x32xf32>
    %cst_72 = arith.constant 1.000000e+00 : f32
    %224 = vector.broadcast %cst_72 : f32 to vector<8x32xf32>
    %225 = arith.addf %224, %223 : vector<8x32xf32>
    %226 = arith.divf %224, %225 : vector<8x32xf32>
    %227 = vector.extract_strided_slice %209 {offsets = [0, 64], sizes = [8, 32], strides = [1, 1]} : vector<8x96xf32> to vector<8x32xf32>
    %228 = vector.extract_strided_slice %210 {offsets = [0, 64], sizes = [8, 32], strides = [1, 1]} : vector<8x96xf32> to vector<8x32xf32>
    %229 = vector.broadcast %22 : vector<1x32xf32> to vector<8x32xf32>
    %230 = arith.addf %228, %229 : vector<8x32xf32>
    %231 = arith.mulf %218, %230 : vector<8x32xf32>
    %232 = arith.addf %227, %231 : vector<8x32xf32>
    %233 = math.tanh %232 : vector<8x32xf32>
    %cst_73 = arith.constant 1.000000e+00 : f32
    %234 = vector.broadcast %cst_73 : f32 to vector<8x32xf32>
    %235 = arith.subf %234, %226 : vector<8x32xf32>
    %236 = arith.mulf %235, %233 : vector<8x32xf32>
    %237 = arith.mulf %226, %165 : vector<8x32xf32>
    %238 = arith.addf %236, %237 : vector<8x32xf32>
    %239 = arith.index_cast %206 : i32 to index
    %c0_74 = arith.constant 0 : index
    %c0_75 = arith.constant 0 : index
    %240 = vector.load %arg20[%239, %c0_74, %c0_75] : memref<4x8x32xf32, #tpu.memory_space<vmem>>, vector<1x8x32xf32>
    %241 = vector.shape_cast %240 : vector<1x8x32xf32> to vector<8x32xf32>
    %242 = vector.shape_cast %238 : vector<8x32xf32> to vector<1x8x32xf32>
    tpu.vector_store %arg20[%239, %c0_74, %c0_75], %242 {strides = array<i32>} : memref<4x8x32xf32, #tpu.memory_space<vmem>>, vector<1x8x32xf32>,
    %c3_i32_76 = arith.constant 3 : i32
    %243 = arith.index_cast %c3_i32_76 : i32 to index
    %c0_77 = arith.constant 0 : index
    %c0_78 = arith.constant 0 : index
    %244 = vector.load %arg17[%243, %c0_77, %c0_78] : memref<4x8x96xf32, #tpu.memory_space<vmem>>, vector<1x8x96xf32>
    %245 = vector.shape_cast %244 : vector<1x8x96xf32> to vector<8x96xf32>
    %cst_79 = arith.constant dense<0.000000e+00> : vector<8x96xf32>
    %246 = tpu.matmul %201, %19, %cst_79 {dimension_numbers = #tpu.dot_dimension_numbers<[1], [0], [0], [1], [0, 0, 1, 1], [], []>} : vector<8x32xf32>, vector<32x96xf32>, vector<8x96xf32> -> vector<8x96xf32>
    %247 = vector.extract_strided_slice %245 {offsets = [0, 0], sizes = [8, 32], strides = [1, 1]} : vector<8x96xf32> to vector<8x32xf32>
    %248 = vector.extract_strided_slice %246 {offsets = [0, 0], sizes = [8, 32], strides = [1, 1]} : vector<8x96xf32> to vector<8x32xf32>
    %249 = arith.addf %247, %248 : vector<8x32xf32>
    %250 = arith.negf %249 : vector<8x32xf32>
    %251 = math.exp %250 : vector<8x32xf32>
    %cst_80 = arith.constant 1.000000e+00 : f32
    %252 = vector.broadcast %cst_80 : f32 to vector<8x32xf32>
    %253 = arith.addf %252, %251 : vector<8x32xf32>
    %254 = arith.divf %252, %253 : vector<8x32xf32>
    %255 = vector.extract_strided_slice %245 {offsets = [0, 32], sizes = [8, 32], strides = [1, 1]} : vector<8x96xf32> to vector<8x32xf32>
    %256 = vector.extract_strided_slice %246 {offsets = [0, 32], sizes = [8, 32], strides = [1, 1]} : vector<8x96xf32> to vector<8x32xf32>
    %257 = arith.addf %255, %256 : vector<8x32xf32>
    %258 = arith.negf %257 : vector<8x32xf32>
    %259 = math.exp %258 : vector<8x32xf32>
    %cst_81 = arith.constant 1.000000e+00 : f32
    %260 = vector.broadcast %cst_81 : f32 to vector<8x32xf32>
    %261 = arith.addf %260, %259 : vector<8x32xf32>
    %262 = arith.divf %260, %261 : vector<8x32xf32>
    %263 = vector.extract_strided_slice %245 {offsets = [0, 64], sizes = [8, 32], strides = [1, 1]} : vector<8x96xf32> to vector<8x32xf32>
    %264 = vector.extract_strided_slice %246 {offsets = [0, 64], sizes = [8, 32], strides = [1, 1]} : vector<8x96xf32> to vector<8x32xf32>
    %265 = vector.broadcast %21 : vector<1x32xf32> to vector<8x32xf32>
    %266 = arith.addf %264, %265 : vector<8x32xf32>
    %267 = arith.mulf %254, %266 : vector<8x32xf32>
    %268 = arith.addf %263, %267 : vector<8x32xf32>
    %269 = math.tanh %268 : vector<8x32xf32>
    %cst_82 = arith.constant 1.000000e+00 : f32
    %270 = vector.broadcast %cst_82 : f32 to vector<8x32xf32>
    %271 = arith.subf %270, %262 : vector<8x32xf32>
    %272 = arith.mulf %271, %269 : vector<8x32xf32>
    %273 = arith.mulf %262, %201 : vector<8x32xf32>
    %274 = arith.addf %272, %273 : vector<8x32xf32>
    %275 = arith.index_cast %c3_i32_76 : i32 to index
    %c0_83 = arith.constant 0 : index
    %c0_84 = arith.constant 0 : index
    %276 = vector.load %arg19[%275, %c0_83, %c0_84] : memref<4x8x32xf32, #tpu.memory_space<vmem>>, vector<1x8x32xf32>
    %277 = vector.shape_cast %276 : vector<1x8x32xf32> to vector<8x32xf32>
    %278 = vector.shape_cast %274 : vector<8x32xf32> to vector<1x8x32xf32>
    tpu.vector_store %arg19[%275, %c0_83, %c0_84], %278 {strides = array<i32>} : memref<4x8x32xf32, #tpu.memory_space<vmem>>, vector<1x8x32xf32>,
    %c3_i32_85 = arith.constant 3 : i32
    %279 = arith.subi %c3_i32_85, %c3_i32_76 : i32
    %280 = arith.index_cast %279 : i32 to index
    %c0_86 = arith.constant 0 : index
    %c0_87 = arith.constant 0 : index
    %281 = vector.load %arg18[%280, %c0_86, %c0_87] : memref<4x8x96xf32, #tpu.memory_space<vmem>>, vector<1x8x96xf32>
    %282 = vector.shape_cast %281 : vector<1x8x96xf32> to vector<8x96xf32>
    %cst_88 = arith.constant dense<0.000000e+00> : vector<8x96xf32>
    %283 = tpu.matmul %238, %20, %cst_88 {dimension_numbers = #tpu.dot_dimension_numbers<[1], [0], [0], [1], [0, 0, 1, 1], [], []>} : vector<8x32xf32>, vector<32x96xf32>, vector<8x96xf32> -> vector<8x96xf32>
    %284 = vector.extract_strided_slice %282 {offsets = [0, 0], sizes = [8, 32], strides = [1, 1]} : vector<8x96xf32> to vector<8x32xf32>
    %285 = vector.extract_strided_slice %283 {offsets = [0, 0], sizes = [8, 32], strides = [1, 1]} : vector<8x96xf32> to vector<8x32xf32>
    %286 = arith.addf %284, %285 : vector<8x32xf32>
    %287 = arith.negf %286 : vector<8x32xf32>
    %288 = math.exp %287 : vector<8x32xf32>
    %cst_89 = arith.constant 1.000000e+00 : f32
    %289 = vector.broadcast %cst_89 : f32 to vector<8x32xf32>
    %290 = arith.addf %289, %288 : vector<8x32xf32>
    %291 = arith.divf %289, %290 : vector<8x32xf32>
    %292 = vector.extract_strided_slice %282 {offsets = [0, 32], sizes = [8, 32], strides = [1, 1]} : vector<8x96xf32> to vector<8x32xf32>
    %293 = vector.extract_strided_slice %283 {offsets = [0, 32], sizes = [8, 32], strides = [1, 1]} : vector<8x96xf32> to vector<8x32xf32>
    %294 = arith.addf %292, %293 : vector<8x32xf32>
    %295 = arith.negf %294 : vector<8x32xf32>
    %296 = math.exp %295 : vector<8x32xf32>
    %cst_90 = arith.constant 1.000000e+00 : f32
    %297 = vector.broadcast %cst_90 : f32 to vector<8x32xf32>
    %298 = arith.addf %297, %296 : vector<8x32xf32>
    %299 = arith.divf %297, %298 : vector<8x32xf32>
    %300 = vector.extract_strided_slice %282 {offsets = [0, 64], sizes = [8, 32], strides = [1, 1]} : vector<8x96xf32> to vector<8x32xf32>
    %301 = vector.extract_strided_slice %283 {offsets = [0, 64], sizes = [8, 32], strides = [1, 1]} : vector<8x96xf32> to vector<8x32xf32>
    %302 = vector.broadcast %22 : vector<1x32xf32> to vector<8x32xf32>
    %303 = arith.addf %301, %302 : vector<8x32xf32>
    %304 = arith.mulf %291, %303 : vector<8x32xf32>
    %305 = arith.addf %300, %304 : vector<8x32xf32>
    %306 = math.tanh %305 : vector<8x32xf32>
    %cst_91 = arith.constant 1.000000e+00 : f32
    %307 = vector.broadcast %cst_91 : f32 to vector<8x32xf32>
    %308 = arith.subf %307, %299 : vector<8x32xf32>
    %309 = arith.mulf %308, %306 : vector<8x32xf32>
    %310 = arith.mulf %299, %238 : vector<8x32xf32>
    %311 = arith.addf %309, %310 : vector<8x32xf32>
    %312 = arith.index_cast %279 : i32 to index
    %c0_92 = arith.constant 0 : index
    %c0_93 = arith.constant 0 : index
    %313 = vector.load %arg20[%312, %c0_92, %c0_93] : memref<4x8x32xf32, #tpu.memory_space<vmem>>, vector<1x8x32xf32>
    %314 = vector.shape_cast %313 : vector<1x8x32xf32> to vector<8x32xf32>
    %315 = vector.shape_cast %311 : vector<8x32xf32> to vector<1x8x32xf32>
    tpu.vector_store %arg20[%312, %c0_92, %c0_93], %315 {strides = array<i32>} : memref<4x8x32xf32, #tpu.memory_space<vmem>>, vector<1x8x32xf32>,
    %c4_i32 = arith.constant 4 : i32
    %c0_94 = arith.constant 0 : index
    %c0_95 = arith.constant 0 : index
    %c0_96 = arith.constant 0 : index
    %316 = vector.load %arg19[%c0_94, %c0_95, %c0_96] : memref<4x8x32xf32, #tpu.memory_space<vmem>>, vector<4x8x32xf32>
    %c0_97 = arith.constant 0 : index
    %c0_98 = arith.constant 0 : index
    %c0_99 = arith.constant 0 : index
    %317 = vector.load %arg20[%c0_97, %c0_98, %c0_99] : memref<4x8x32xf32, #tpu.memory_space<vmem>>, vector<4x8x32xf32>
    %318 = tpu.concatenate %316, %317 in 2 : vector<4x8x32xf32>, vector<4x8x32xf32> -> vector<4x8x64xf32>
    %cst_100 = arith.constant dense<0.000000e+00> : vector<4x8xf32>
    %319 = vector.multi_reduction <add>, %318, %cst_100 [2] : vector<4x8x64xf32> to vector<4x8xf32>
    %320 = vector.shape_cast %319 : vector<4x8xf32> to vector<4x8x1xf32>
    %cst_101 = arith.constant 6.400000e+01 : f32
    %321 = vector.broadcast %cst_101 : f32 to vector<4x8x1xf32>
    %322 = arith.divf %320, %321 : vector<4x8x1xf32>
    %323 = vector.broadcast %322 : vector<4x8x1xf32> to vector<4x8x64xf32>
    %324 = arith.subf %318, %323 : vector<4x8x64xf32>
    %325 = arith.mulf %324, %324 : vector<4x8x64xf32>
    %cst_102 = arith.constant dense<0.000000e+00> : vector<4x8xf32>
    %326 = vector.multi_reduction <add>, %325, %cst_102 [2] : vector<4x8x64xf32> to vector<4x8xf32>
    %327 = vector.shape_cast %326 : vector<4x8xf32> to vector<4x8x1xf32>
    %cst_103 = arith.constant 6.400000e+01 : f32
    %328 = vector.broadcast %cst_103 : f32 to vector<4x8x1xf32>
    %329 = arith.divf %327, %328 : vector<4x8x1xf32>
    %330 = vector.broadcast %322 : vector<4x8x1xf32> to vector<4x8x64xf32>
    %331 = arith.subf %318, %330 : vector<4x8x64xf32>
    %cst_104 = arith.constant 9.99999974E-6 : f32
    %332 = vector.broadcast %cst_104 : f32 to vector<4x8x1xf32>
    %333 = arith.addf %329, %332 : vector<4x8x1xf32>
    %334 = math.rsqrt %333 : vector<4x8x1xf32>
    %335 = vector.broadcast %334 : vector<4x8x1xf32> to vector<4x8x64xf32>
    %336 = arith.mulf %331, %335 : vector<4x8x64xf32>
    %c0_105 = arith.constant 0 : index
    %c0_106 = arith.constant 0 : index
    %337 = vector.load %arg9[%c0_105, %c0_106] : memref<1x64xf32, #tpu.memory_space<vmem>>, vector<1x64xf32>
    %338 = vector.shape_cast %337 : vector<1x64xf32> to vector<1x1x64xf32>
    %339 = vector.broadcast %338 : vector<1x1x64xf32> to vector<4x8x64xf32>
    %340 = arith.mulf %336, %339 : vector<4x8x64xf32>
    %c0_107 = arith.constant 0 : index
    %c0_108 = arith.constant 0 : index
    %341 = vector.load %arg10[%c0_107, %c0_108] : memref<1x64xf32, #tpu.memory_space<vmem>>, vector<1x64xf32>
    %342 = vector.shape_cast %341 : vector<1x64xf32> to vector<1x1x64xf32>
    %343 = vector.broadcast %342 : vector<1x1x64xf32> to vector<4x8x64xf32>
    %344 = arith.addf %340, %343 : vector<4x8x64xf32>
    %345 = vector.shape_cast %344 : vector<4x8x64xf32> to vector<32x64xf32>
    %c0_109 = arith.constant 0 : index
    %c0_110 = arith.constant 0 : index
    %346 = vector.load %arg11[%c0_109, %c0_110] : memref<64x32xf32, #tpu.memory_space<vmem>>, vector<64x32xf32>
    %cst_111 = arith.constant dense<0.000000e+00> : vector<32x32xf32>
    %347 = tpu.matmul %345, %346, %cst_111 {dimension_numbers = #tpu.dot_dimension_numbers<[1], [0], [0], [1], [0, 0, 1, 1], [], []>} : vector<32x64xf32>, vector<64x32xf32>, vector<32x32xf32> -> vector<32x32xf32>
    %c0_112 = arith.constant 0 : index
    %c0_113 = arith.constant 0 : index
    %348 = vector.load %arg12[%c0_112, %c0_113] : memref<1x32xf32, #tpu.memory_space<vmem>>, vector<1x32xf32>
    %349 = vector.broadcast %348 : vector<1x32xf32> to vector<32x32xf32>
    %350 = arith.addf %347, %349 : vector<32x32xf32>
    %351 = math.tanh %350 : vector<32x32xf32>
    %352 = vector.shape_cast %351 : vector<32x32xf32> to vector<4x8x32xf32>
    %c0_114 = arith.constant 0 : index
    %c0_115 = arith.constant 0 : index
    %353 = vector.load %arg13[%c0_114, %c0_115] : memref<1x32xf32, #tpu.memory_space<vmem>>, vector<1x32xf32>
    %354 = vector.shape_cast %353 : vector<1x32xf32> to vector<1x1x32xf32>
    %355 = vector.broadcast %354 : vector<1x1x32xf32> to vector<4x8x32xf32>
    %356 = arith.mulf %352, %355 : vector<4x8x32xf32>
    %cst_116 = arith.constant dense<0.000000e+00> : vector<4x8xf32>
    %357 = vector.multi_reduction <add>, %356, %cst_116 [2] : vector<4x8x32xf32> to vector<4x8xf32>
    %c0_117 = arith.constant 0 : index
    %c0_118 = arith.constant 0 : index
    %358 = vector.load %arg14[%c0_117, %c0_118] : memref<1x1xf32, #tpu.memory_space<vmem>>, vector<1x1xf32>
    %359 = vector.broadcast %358 : vector<1x1xf32> to vector<4x8xf32>
    %360 = arith.addf %357, %359 : vector<4x8xf32>
    %cst_119 = arith.constant dense<0xFF800000> : vector<4xf32>
    %361 = vector.multi_reduction <maximumf>, %360, %cst_119 [1] : vector<4x8xf32> to vector<4xf32>
    %362 = vector.shape_cast %361 : vector<4xf32> to vector<4x1xf32>
    %363 = vector.broadcast %362 : vector<4x1xf32> to vector<4x8xf32>
    %364 = arith.subf %360, %363 : vector<4x8xf32>
    %365 = math.exp %364 : vector<4x8xf32>
    %cst_120 = arith.constant dense<0.000000e+00> : vector<4xf32>
    %366 = vector.multi_reduction <add>, %365, %cst_120 [1] : vector<4x8xf32> to vector<4xf32>
    %367 = vector.shape_cast %366 : vector<4xf32> to vector<4x1xf32>
    %368 = tpu.reciprocal %367 {approx = true} : vector<4x1xf32> -> vector<4x1xf32>
    %369 = vector.broadcast %368 : vector<4x1xf32> to vector<4x8xf32>
    %370 = arith.mulf %365, %369 : vector<4x8xf32>
    %371 = vector.shape_cast %370 : vector<4x8xf32> to vector<4x8x1xf32>
    %372 = vector.broadcast %371 : vector<4x8x1xf32> to vector<4x8x64xf32>
    %373 = arith.mulf %344, %372 : vector<4x8x64xf32>
    %cst_121 = arith.constant dense<0.000000e+00> : vector<4x64xf32>
    %374 = vector.multi_reduction <add>, %373, %cst_121 [1] : vector<4x8x64xf32> to vector<4x64xf32>
    %c0_122 = arith.constant 0 : index
    %c0_123 = arith.constant 0 : index
    %375 = vector.load %arg15[%c0_122, %c0_123] : memref<4x64xf32, #tpu.memory_space<vmem>>, vector<4x64xf32>
    tpu.vector_store %arg15[%c0_122, %c0_123], %374 {strides = array<i32>} : memref<4x64xf32, #tpu.memory_space<vmem>>, vector<4x64xf32>,
    %c0_124 = arith.constant 0 : index
    %c0_125 = arith.constant 0 : index
    %376 = vector.load %arg16[%c0_124, %c0_125] : memref<4x8xf32, #tpu.memory_space<vmem>>, vector<4x8xf32>
    tpu.vector_store %arg16[%c0_124, %c0_125], %370 {strides = array<i32>} : memref<4x8xf32, #tpu.memory_space<vmem>>, vector<4x8xf32>,
    return
  }
}

</mosaic_0001>

<bundles_post_ra>
// kernel: sent_attn_net_forward.1
= control target key start
LH: loop header
LB: loop body
LE: loop exit
PB: predicated region body
PF: predicated region fallthrough
CT: control target
= control target key end

     0   :  { %s2718_s0 = inlined_call_operand.hbm [shape: f32[4,8,32], index: 0, kind: input, shape index: {}]   ;;  %s2719_s1 = inlined_call_operand.hbm [shape: f32[32,96], index: 1, kind: input, shape index: {}]   ;;  %s2720_s2 = inlined_call_operand.hbm [shape: f32[32,96], index: 2, kind: input, shape index: {}]   ;;  %s2721_s3 = inlined_call_operand.hbm [shape: f32[1,96], index: 3, kind: input, shape index: {}]   ;;  %s2722_s4 = inlined_call_operand.vmem [shape: f32[1,32], index: 4, kind: input, shape index: {}]   ;;  %s2723_s5 = inlined_call_operand.hbm [shape: f32[32,96], index: 5, kind: input, shape index: {}]   ;;  %s2724_s6 = inlined_call_operand.vmem [shape: f32[32,96], index: 6, kind: input, shape index: {}]   ;;  %s2725_s7 = inlined_call_operand.vmem [shape: f32[1,96], index: 7, kind: input, shape index: {}]   ;;  %s2726_s8 = inlined_call_operand.vmem [shape: f32[1,32], index: 8, kind: input, shape index: {}]   ;;  %s2727_s9 = inlined_call_operand.vmem [shape: f32[1,64], index: 9, kind: input, shape index: {}]   ;;  %s2728_s10 = inlined_call_operand.vmem [shape: f32[1,64], index: 10, kind: input, shape index: {}]   ;;  %s2729_s11 = inlined_call_operand.hbm [shape: f32[64,32], index: 11, kind: input, shape index: {}]   ;;  %s2730_s12 = inlined_call_operand.vmem [shape: f32[1,32], index: 12, kind: input, shape index: {}]   ;;  %s2731_s13 = inlined_call_operand.vmem [shape: f32[1,32], index: 13, kind: input, shape index: {}]   ;;  %s2732_s14 = inlined_call_operand.<no memory space> [shape: f32[1,1], index: 14, kind: input, shape index: {}]   ;;  %s2733_s15 = inlined_call_operand.hbm [shape: f32[4,64], index: 15, kind: output, shape index: {0}]   ;;  %s2734_s16 = inlined_call_operand.hbm [shape: f32[4,8], index: 16, kind: output, shape index: {1}]  }
   0x1   :  { %2736 = sst [smem:[#allocation27_spill]] %s2718_s0  ;;  %v22_v0 = vstv %s2732_s14 }
   0x2   :  { %23 = vst [vmem:[#allocation6] sm:$0x1] %v22_v0 }
   0x3   :  { %24 = vsyncpa [#allocation8], 0 }
   0x4   :  { %25 = vsyncpa [#allocation11], 0 }
   0x5   :  { %26 = vsyncpa [#allocation14], 0 }
   0x6   :  { %27 = vsyncpa [#allocation17], 0 }
   0x7   :  { %28 = vsyncpa [#allocation9], 0 }
   0x8   :  { %29 = vsyncpa [#allocation20], 0  ;;  %s2225_s23 = smov [#allocation10]   ;;  %s2226_s25 = smov [#allocation13]  }
   0x9   :  { %s47_s24 = sshll.u32 %s2225_s23, 4  ;;  %s72_s26 = sshll.u32 %s2226_s25, 4  ;;  %s48_s24 = int_to_ptr.vmem [resolvable:$true] %s47_s24  ;;  %s2330_s26 = int_to_ptr.vmem [resolvable:$true] %s72_s26 }
   0xa   :  { %s2037_s29 = scalar_lea.hbm %s2719_s1, 512 }
   0xb   :  { %p2038_p0 = scmp.ne.s32.totalorder %s2719_s1, %s2037_s29  ;;  %p2041_p1 = scmp.lt.u32.totalorder %s2037_s29, %s2719_s1 }
   0xd   :  { %p2043_p2 = pnand %p2041_p1, %p2038_p0 }
   0xf   :  { %2046 = shalt.err (!%p2043_p2)
}
  0x10   :  { %s2047_s18 = scalar_lea.vmem %s48_s24, 512  ;;  %p2052_p4 = scmp.lt.s32.totalorder %s48_s24, %s48_s24 }
  0x11   :  { %p2048_p3 = scmp.ne.s32.totalorder %s48_s24, %s2047_s18  ;;  %p2053_p5 = scmp.lt.s32.totalorder %s2047_s18, %s2047_s18 }
  0x13   :  { %p2054_p6 = por %p2053_p5, %p2052_p4 }
  0x15   :  { %p2055_p7 = pnand %p2054_p6, %p2048_p3 }
  0x17   :  { %2058 = shalt.err (!%p2055_p7)
}
  0x18   :  { %s2227_s19 = smov 128   ;;  %s2228_s20 = smov 8  }
  0x19   :  { %53 = dma.hbm_to_vmem [thread:$0]  %s2719_s1, 512, %s48_s24, [#allocation11], %s2227_s19, %s2227_s19, %s2228_s20  }
  0x1a   :  { %s2059_s27 = scalar_lea.hbm %s2721_s3, 16 }
  0x1b   :  { %p2060_p8 = scmp.ne.s32.totalorder %s2721_s3, %s2059_s27  ;;  %p2063_p9 = scmp.lt.u32.totalorder %s2059_s27, %s2721_s3 }
  0x1d   :  { %p2065_p10 = pnand %p2063_p9, %p2060_p8 }
  0x1f   :  { %2068 = shalt.err (!%p2065_p10)
}
  0x20   :  { %s2069_s0 = scalar_lea.vmem %s2330_s26, 16  ;;  %s2073_s1 = scalar_lea.vmem %s2330_s26, 32 }
  0x21   :  { %p2070_p11 = scmp.ne.s32.totalorder %s2330_s26, %s2069_s0  ;;  %p2074_p12 = scmp.lt.s32.totalorder %s2330_s26, %s2330_s26 }
  0x22   :  { %p2075_p13 = scmp.lt.s32.totalorder %s2073_s1, %s2069_s0 }
  0x24   :  { %p2076_p0 = por %p2075_p13, %p2074_p12 }
  0x26   :  { %p2077_p1 = pnand %p2076_p0, %p2070_p11 }
  0x28   :  { %2080 = shalt.err (!%p2077_p1)
}
  0x29   :  { %75 = dma.hbm_to_vmem [thread:$0]  %s2721_s3, 16, %s2330_s26, [#allocation14]  }
  0x2a   :  { %s2229_s18 = smov [#allocation7]   ;;  %s2230_s22 = smov [#allocation12]  }
  0x2b   :  { %s35_s21 = sshll.u32 %s2229_s18, 4  ;;  %s59_s23 = sshll.u32 %s2230_s22, 4  ;;  %s36_s21 = int_to_ptr.vmem [resolvable:$true] %s35_s21  ;;  %s2365_s23 = int_to_ptr.vmem [resolvable:$true] %s59_s23 }
  0x2c   :  { %s2737_s28 = sld [smem:[#allocation27_spill]] }
  0x32   :  { %s2081_s29 = scalar_lea.hbm %s2737_s28, 512 }
  0x33   :  { %p2082_p2 = scmp.ne.s32.totalorder %s2737_s28, %s2081_s29  ;;  %p2085_p3 = scmp.lt.u32.totalorder %s2081_s29, %s2737_s28 }
  0x35   :  { %p2087_p4 = pnand %p2085_p3, %p2082_p2 }
  0x37   :  { %2090 = shalt.err (!%p2087_p4)
}
  0x38   :  { %s2091_s3 = scalar_lea.vmem %s36_s21, 512  ;;  %p2096_p6 = scmp.lt.s32.totalorder %s36_s21, %s36_s21 }
  0x39   :  { %p2092_p5 = scmp.ne.s32.totalorder %s36_s21, %s2091_s3  ;;  %p2097_p7 = scmp.lt.s32.totalorder %s2091_s3, %s2091_s3 }
  0x3b   :  { %p2098_p8 = por %p2097_p7, %p2096_p6 }
  0x3d   :  { %p2099_p9 = pnand %p2098_p8, %p2092_p5 }
  0x3f   :  { %2102 = shalt.err (!%p2099_p9)
}
  0x40   :  { %41 = dma.hbm_to_vmem [thread:$0]  %s2737_s28, 512, %s36_s21, [#allocation8], %s2227_s19, %s2227_s19, %s2228_s20  }
  0x41   :  { %s2103_s22 = scalar_lea.hbm %s2720_s2, 512 }
  0x42   :  { %p2104_p10 = scmp.ne.s32.totalorder %s2720_s2, %s2103_s22  ;;  %p2107_p11 = scmp.lt.u32.totalorder %s2103_s22, %s2720_s2 }
  0x44   :  { %p2109_p12 = pnand %p2107_p11, %p2104_p10 }
  0x46   :  { %2112 = shalt.err (!%p2109_p12)
}
  0x47   :  { %s2113_s14 = scalar_lea.vmem %s2365_s23, 512  ;;  %p2118_p0 = scmp.lt.s32.totalorder %s2365_s23, %s2365_s23 }
  0x48   :  { %p2114_p13 = scmp.ne.s32.totalorder %s2365_s23, %s2113_s14  ;;  %p2119_p1 = scmp.lt.s32.totalorder %s2113_s14, %s2113_s14 }
  0x4a   :  { %p2120_p2 = por %p2119_p1, %p2118_p0 }
  0x4c   :  { %p2121_p3 = pnand %p2120_p2, %p2114_p13 }
  0x4e   :  { %2124 = shalt.err (!%p2121_p3)
}
  0x4f   :  { %65 = dma.hbm_to_vmem [thread:$0]  %s2720_s2, 512, %s2365_s23, [#allocation11], %s2227_s19, %s2227_s19, %s2228_s20  }
  0x50   :  { %s2231_s0 = smov [#allocation15]   ;;  %s2232_s3 = smov [#allocation16]  }
  0x51   :  { %s83_s1 = sshll.u32 %s2231_s0, 4  ;;  %s105_s26 = sshll.u32 %s2232_s3, 4  ;;  %s84_s1 = int_to_ptr.vmem [resolvable:$true] %s83_s1  ;;  %s2402_s26 = int_to_ptr.vmem [resolvable:$true] %s105_s26 }
  0x52   :  { %s2125_s18 = scalar_lea.hbm %s2723_s5, 512 }
  0x53   :  { %p2126_p4 = scmp.ne.s32.totalorder %s2723_s5, %s2125_s18  ;;  %p2129_p5 = scmp.lt.u32.totalorder %s2125_s18, %s2723_s5 }
  0x55   :  { %p2131_p6 = pnand %p2129_p5, %p2126_p4 }
  0x57   :  { %2134 = shalt.err (!%p2131_p6)
}
  0x58   :  { %s2135_s2 = scalar_lea.vmem %s84_s1, 512  ;;  %p2140_p8 = scmp.lt.s32.totalorder %s84_s1, %s84_s1 }
  0x59   :  { %p2136_p7 = scmp.ne.s32.totalorder %s84_s1, %s2135_s2  ;;  %p2141_p9 = scmp.lt.s32.totalorder %s2135_s2, %s2135_s2 }
  0x5b   :  { %p2142_p10 = por %p2141_p9, %p2140_p8 }
  0x5d   :  { %p2143_p11 = pnand %p2142_p10, %p2136_p7 }
  0x5f   :  { %2146 = shalt.err (!%p2143_p11)
}
  0x60   :  { %89 = dma.hbm_to_vmem [thread:$0]  %s2723_s5, 512, %s84_s1, [#allocation14], %s2227_s19, %s2227_s19, %s2228_s20  }
  0x61   :  { %s2147_s28 = scalar_lea.hbm %s2729_s11, 1024 }
  0x62   :  { %p2148_p12 = scmp.ne.s32.totalorder %s2729_s11, %s2147_s28  ;;  %p2151_p13 = scmp.lt.u32.totalorder %s2147_s28, %s2729_s11 }
  0x64   :  { %p2153_p0 = pnand %p2151_p13, %p2148_p12 }
  0x66   :  { %2156 = shalt.err (!%p2153_p0)
}
  0x67   :  { %s2157_s18 = scalar_lea.vmem %s2402_s26, 1024  ;;  %p2162_p2 = scmp.lt.s32.totalorder %s2402_s26, %s2402_s26 }
  0x68   :  { %p2158_p1 = scmp.ne.s32.totalorder %s2402_s26, %s2157_s18  ;;  %p2163_p3 = scmp.lt.s32.totalorder %s2157_s18, %s2157_s18 }
  0x6a   :  { %p2164_p4 = por %p2163_p3, %p2162_p2 }
  0x6c   :  { %p2165_p5 = pnand %p2164_p4, %p2158_p1 }
  0x6e   :  { %2168 = shalt.err (!%p2165_p5)
}
  0x6f   :  { %111 = dma.hbm_to_vmem [thread:$0]  %s2729_s11, 1024, %s2402_s26, [#allocation17], %s2227_s19, %s2227_s19, %s2228_s20  }
  0x70   :  { %2213 = dma.done.wait [#allocation8], 512  }
  0x71   :  { %2214 = vsyncadd [#allocation8], 4294966784 }
  0x72   :  { %2215 = dma.done.wait [#allocation11], 1024  }
  0x73   :  { %2216 = vsyncadd [#allocation11], 4294966272 }
  0x74   :  { %2217 = dma.done.wait [#allocation14], 528  }
  0x75   :  { %2218 = vsyncadd [#allocation14], 4294966768 }
  0x76   :  { %2219 = dma.done.wait [#allocation17], 1024  }
  0x77   :  { %2220 = vsyncadd [#allocation17], 4294966272  ;;  %v2233_v1 = vmov 0.0|0.0   ;;  %vm2234_vm0 = vmmov 0   ;;  %v2235_v2 = vmov 0.0   ;;  %v143_v3 = vld [vmem:[#allocation10] sm:$0xff] }
  0x78   :  { %1880 = vmatprep.subr.bf16.mxu0 %v2233_v1  ;;  %1778 = vmatprep.mubr.msk.f32.mxu0 %vm2234_vm0, %v2235_v2  ;;  %v144_v4 = vld [vmem:[#allocation10 + $0x8] sm:$0xff]  ;;  %v145_v5 = vld [vmem:[#allocation10 + $0x10] sm:$0xff]  ;;  %v146_v7 = vld [vmem:[#allocation10 + $0x18] sm:$0xff]  ;;  %vm156_vm1 = vcmask 261120   ;;  %s2236_s20 = smov 64   ;;  %vm212_vm2 = vcmask 785408  }
  0x79   :  { %v147_v6 = vpack.c.bf16 %v144_v4, %v143_v3  ;;  %v137_v8 = vld [vmem:[#allocation7] sm:$0xff]  ;;  %v138_v9 = vld [vmem:[#allocation7 + $0x8] sm:$0xff]  ;;  %v148_v10 = vpack.c.bf16 %v146_v7, %v145_v5  ;;  %v139_v13 = vld [vmem:[#allocation7 + $0x10] sm:$0xff]  ;;  %s2238_s21 = smov 32   ;;  %vm1188_vm3 = vcmask 523264   ;;  %vm1439_vm4 = vcmask 1041409  }
  0x7a   :  { %v141_v11 = vpack.c.bf16 %v138_v9, %v137_v8  ;;  %v217_v12 = vld [vmem:[#allocation15] sm:$0xff]  ;;  %v140_v14 = vld [vmem:[#allocation7 + $0x18] sm:$0xff]  ;;  %v218_v15 = vld [vmem:[#allocation15 + $0x8] sm:$0xff]  ;;  %vm1441_vm5 = vcmask 1042434   ;;  %vm1443_vm6 = vcmask 1043459   ;;  %vm1446_vm7 = vcmask 60416  }
  0x7b   :  { %1754 = vmatprep.subr.bf16.mxu1 %v147_v6  ;;  %v283_v16 = vld [vmem:[#allocation12] sm:$0xff]  ;;  %v284_v17 = vld [vmem:[#allocation12 + $0x8] sm:$0xff]  ;;  %v285_v18 = vld [vmem:[#allocation12 + $0x10] sm:$0xff]  ;;  %v221_v19 = vpack.c.bf16 %v218_v15, %v217_v12  ;;  %v142_v25 = vpack.c.bf16 %v140_v14, %v139_v13 }
  0x7c   :  { %1755 = vmatpush3.bf16.msra.mxu1 %v147_v6  ;;  %1758 = vmatprep.mubr.msk.bf16.mxu1 %vm156_vm1, %v141_v11  ;;  %v2443_v20 = vpack.c.bf16 %v284_v17, %v283_v16  ;;  %v286_v21 = vld [vmem:[#allocation12 + $0x18] sm:$0xff]  ;;  %v288_v30 = vld [vmem:[%s2724_s6 + $0x8] sm:$0xff]  ;;  %v289_v32 = vld [vmem:[%s2724_s6 + $0x10] sm:$0xff] }
  0x7d   :  { %1756 = vmatprep.subr.bf16.mxu1 %v148_v10  ;;  %v219_v22 = vld [vmem:[#allocation15 + $0x10] sm:$0xff]  ;;  %v220_v23 = vld [vmem:[#allocation15 + $0x18] sm:$0xff]  ;;  %v2449_v26 = vpack.c.bf16 %v286_v21, %v285_v18 }
  0x7e   :  { %v1672_v24 = vld [vmem:[%s2726_s8] ss:$0 sm:$0xff]  ;;  %1882 = vmatpush3.bf16.msra.mxu0 %v2443_v20  ;;  %v222_v28 = vpack.c.bf16 %v220_v23, %v219_v22  ;;  %v290_v33 = vld [vmem:[%s2724_s6 + $0x18] sm:$0xff]  ;;  %v1663_v35 = vld [vmem:[#allocation13] ss:$0 sm:$0xff] }
  0x7f   :  { %491 = vrot.lane.b32.xlu0 %v1672_v24, %s2236_s20  ;;  %v1670_v27 = vld [vmem:[%s2722_s4] ss:$0 sm:$0xff]  ;;  %1883 = vmatprep.subr.bf16.mxu0 %v2233_v1  ;;  %v2484_v34 = vpack.c.bf16 %v290_v33, %v289_v32 }
  0x80   :  { %1757 = vmatpush3.bf16.msra.mxu1 %v148_v10  ;;  %379 = vrot.lane.b32.xlu1 %v1670_v27, %s2236_s20  ;;  %v287_v29 = vld [vmem:[%s2724_s6] sm:$0xff] }
  0x81   :  { %1762 = vmatprep.subr.bf16.mxu1 %v221_v19  ;;  %v2471_v31 = vpack.c.bf16 %v288_v30, %v287_v29  ;;  %v1666_v46 = vld [vmem:[%s2725_s7] ss:$0 sm:$0xff]  ;;  %s2237_s7 = smov 96  }
  0x82   :  { %1885 = vmatpush3.bf16.msra.mxu0 %v2449_v26 }
  0x83   :  { %1759 = vmatmul.mubr.msk.bf16.vlgmr.msra.gmra.mrb[0].mxu1 %vm156_vm1, %v142_v25  ;;  %1892 = vmatprep.subr.bf16.mxu0 %v2233_v1 }
  0x84   :  { %1763 = vmatpush3.bf16.msra.mxu1 %v221_v19  ;;  %1766 = vmatprep.mubr.msk.bf16.mxu1 %vm156_vm1, %v141_v11 }
  0x85   :  { %1764 = vmatprep.subr.bf16.mxu1 %v222_v28  ;;  %1779 = vmatmul.mubr.f32.vlgmr.msra.gmra.mrb[0].mxu0 %v2235_v2 }
  0x86   :  { %1894 = vmatpush3.bf16.msra.mxu0 %v2443_v20  ;;  %1800 = vmatprep.mubr.msk.f32.mxu0 %vm2234_vm0, %v2235_v2 }
  0x87   :  { %1895 = vmatprep.subr.bf16.mxu0 %v2233_v1 }
  0x88   :  { %1765 = vmatpush3.bf16.msra.mxu1 %v222_v28 }
  0x89   :  { %1886 = vmatprep.subr.bf16.mxu1 %v2233_v1 }
  0x8a   :  { %1897 = vmatpush3.bf16.msra.mxu0 %v2449_v26 }
  0x8b   :  { %1767 = vmatmul.mubr.msk.bf16.vlgmr.msra.gmra.mrb[4].mxu1 %vm156_vm1, %v142_v25  ;;  %1904 = vmatprep.subr.bf16.mxu0 %v2233_v1 }
  0x8c   :  { %1888 = vmatpush3.bf16.msra.mxu1 %v2471_v31  ;;  %1789 = vmatprep.mubr.msk.f32.mxu1 %vm2234_vm0, %v2235_v2 }
  0x8d   :  { %1889 = vmatprep.subr.bf16.mxu1 %v2233_v1 }
  0x90   :  { %1891 = vmatpush3.bf16.msra.mxu1 %v2484_v34 }
  0x91   :  { %1898 = vmatprep.subr.bf16.mxu1 %v2233_v1 }
  0x93   :  { %1790 = vmatmul.mubr.f32.vlgmr.msra.gmra.mrb[8].mxu1 %v2235_v2 }
  0x94   :  { %1900 = vmatpush3.bf16.msra.mxu1 %v2471_v31  ;;  %1811 = vmatprep.mubr.msk.f32.mxu1 %vm2234_vm0, %v2235_v2 }
  0x95   :  { %1901 = vmatprep.subr.bf16.mxu1 %v2233_v1 }
  0x98   :  { %1903 = vmatpush3.bf16.msra.mxu1 %v2484_v34 }
  0x99   :  { %1910 = vmatprep.subr.bf16.mxu1 %v2233_v1 }
  0xf1   :  { %v2510_v55 = vpop.permute.xlu0 %491 }
  0xf2   :  { %v2512_v57 = vpop.permute.xlu1 %379 }
 0x156   :  { %v1760_v36 = vpop.f32.mrb[0].mxu1 }
 0x157   :  { %v206_v37 = vadd.f32 %v1760_v36, %v1663_v35  ;;  %v197_v38 = vpop.f32.mrb[1].mxu1 }
 0x158   :  { %v198_v39 = vadd.f32 %v1663_v35, %v197_v38  ;;  %v1761_v40 = vpop.f32.mrb[2].mxu1  ;;  %v363_v43 = vpop.f32.mrb[0].mxu0 }
 0x159   :  { %215 = vst.msk [vmem:[#allocation2 + $0x10] sm:$0xff] %vm212_vm2, %v206_v37  ;;  %v209_v41 = vadd.f32 %v1761_v40, %v1663_v35  ;;  %v200_v42 = vpop.f32.mrb[3].mxu1  ;;  %v1780_v45 = vpop.f32.mrb[1].mxu0  ;;  %v382_v60 = vadd.f32 %v2512_v57, %v363_v43 }
 0x15a   :  { %213 = vst.msk [vmem:[#allocation2] sm:$0xff] %vm212_vm2, %v198_v39  ;;  %v201_v44 = vadd.f32 %v1663_v35, %v200_v42 }
 0x15b   :  { %216 = vst.msk [vmem:[#allocation2 + $0x18] sm:$0xff] %vm212_vm2, %v209_v41 }
 0x15c   :  { %214 = vst.msk [vmem:[#allocation2 + $0x8] sm:$0xff] %vm212_vm2, %v201_v44 }
 0x15e   :  { %v1768_v47 = vpop.f32.mrb[4].mxu1 }
 0x15f   :  { %v273_v48 = vadd.f32 %v1768_v47, %v1666_v46  ;;  %v264_v49 = vpop.f32.mrb[5].mxu1 }
 0x160   :  { %v265_v50 = vadd.f32 %v1666_v46, %v264_v49  ;;  %v1769_v51 = vpop.f32.mrb[6].mxu1 }
 0x161   :  { %281 = vst.msk [vmem:[#allocation3 + $0x10] sm:$0xff] %vm212_vm2, %v273_v48  ;;  %v276_v52 = vadd.f32 %v1769_v51, %v1666_v46  ;;  %v267_v53 = vpop.f32.mrb[7].mxu1  ;;  %v293_v63 = vld [vmem:[#allocation2] sm:$0xff] }
 0x162   :  { %279 = vst.msk [vmem:[#allocation3] sm:$0xff] %vm212_vm2, %v265_v50  ;;  %v268_v54 = vadd.f32 %v1666_v46, %v267_v53  ;;  %v367_v0 = vadd.f32 %v363_v43, %v293_v63 }
 0x163   :  { %282 = vst.msk [vmem:[#allocation3 + $0x18] sm:$0xff] %vm212_vm2, %v276_v52  ;;  %v521_v45 = vld [vmem:[#allocation2 + $0x8] sm:$0xff] }
 0x164   :  { %280 = vst.msk [vmem:[#allocation3 + $0x8] sm:$0xff] %vm212_vm2, %v268_v54  ;;  %v1669_v4 = vmul.f32 -1.442695, %v367_v0 }
 0x166   :  { %v475_v56 = vpop.f32.mrb[8].mxu1 }
 0x167   :  { %v494_v58 = vadd.f32 %v2510_v55, %v475_v56  ;;  %v1791_v59 = vpop.f32.mrb[9].mxu1 }
 0x168   :  { %v628_v43 = vld [vmem:[#allocation3 + $0x10] sm:$0xff] }
 0x169   :  { %496 = vrot.lane.b32.xlu0 %v494_v58, %s2236_s20 }
 0x16a   :  { %v408_v61 = vld [vmem:[#allocation3 + $0x18] sm:$0xff] }
 0x16b   :  { %v479_v62 = vadd.f32 %v475_v56, %v408_v61 }
 0x16d   :  { %384 = vrot.lane.b32.xlu0 %v382_v60, %s2236_s20  ;;  %v1671_v3 = vmul.f32 -1.442695, %v479_v62 }
 0x16f   :  { %1963 = vpow2.f32 %v1671_v3 }
 0x170   :  { %1965 = vpow2.f32 %v1669_v4 }
 0x179   :  { %v1964_v5 = vpop.eup %1963 }
 0x17a   :  { %v483_v6 = vadd.f32 1.0, %v1964_v5  ;;  %v1966_v7 = vpop.eup %1965 }
 0x17b   :  { %v371_v8 = vadd.f32 1.0, %v1966_v7 }
 0x17c   :  { %1967 = vrcp.f32 %v483_v6 }
 0x17d   :  { %1969 = vrcp.f32 %v371_v8 }
 0x186   :  { %v1968_v9 = vpop.eup %1967 }
 0x187   :  { %v1970_v12 = vpop.eup %1969  ;;  %v506_v22 = vsub.f32 1.0, %v1968_v9  ;;  %v512_v24 = vmul.f32 0.0, %v1968_v9 }
 0x188   :  { %v394_v28 = vsub.f32 1.0, %v1970_v12  ;;  %v400_v30 = vmul.f32 0.0, %v1970_v12 }
 0x1db   :  { %v497_v10 = vpop.permute.xlu0 %496 }
 0x1dc   :  { %v499_v11 = vmul.f32 %v1968_v9, %v497_v10 }
 0x1de   :  { %501 = vrot.lane.b32.xlu1 %v499_v11, %s2236_s20 }
 0x1df   :  { %v385_v13 = vpop.permute.xlu0 %384 }
 0x1e0   :  { %v387_v14 = vmul.f32 %v1970_v12, %v385_v13 }
 0x1e2   :  { %389 = vrot.lane.b32.xlu1 %v387_v14, %s2236_s20 }
 0x250   :  { %v502_v15 = vpop.permute.xlu1 %501 }
 0x251   :  { %v504_v16 = vadd.f32 %v502_v15, %v408_v61 }
 0x253   :  { %1971 = vtanh.f32 %v504_v16 }
 0x254   :  { %v390_v17 = vpop.permute.xlu1 %389 }
 0x255   :  { %v392_v18 = vadd.f32 %v390_v17, %v293_v63 }
 0x257   :  { %1973 = vtanh.f32 %v392_v18 }
 0x25d   :  { %v1972_v19 = vpop.eup %1971 }
 0x25e   :  { %508 = vrot.lane.b32.xlu0 %v1972_v19, %s2237_s7 }
 0x261   :  { %v1974_v21 = vpop.eup %1973 }
 0x262   :  { %396 = vrot.lane.b32.xlu0 %v1974_v21, %s2237_s7 }
 0x2d0   :  { %v509_v23 = vpop.permute.xlu0 %508 }
 0x2d1   :  { %v511_v25 = vmul.f32 %v509_v23, %v506_v22 }
 0x2d3   :  { %v2522_v27 = vadd.f32 %v512_v24, %v511_v25 }
 0x2d4   :  { %v397_v29 = vpop.permute.xlu0 %396 }
 0x2d5   :  { %v399_v32 = vmul.f32 %v397_v29, %v394_v28  ;;  %515 = vrot.lane.b32.xlu1 %v2522_v27, %s2237_s7 }
 0x2d7   :  { %v2526_v33 = vadd.f32 %v400_v30, %v399_v32 }
 0x2d9   :  { %403 = vrot.lane.b32.xlu1 %v2526_v33, %s2237_s7 }
 0x347   :  { %v516_v35 = vpop.permute.xlu1 %515 }
 0x348   :  { %519 = vst.msk [vmem:[#allocation5 + $0x18] sm:$0xff] %vm156_vm1, %v516_v35  ;;  %1812 = vmatmul.mubr.msk.f32.vlgmr.msra.gmra.mrb[10].mxu1 %vm156_vm1, %v516_v35 }
 0x349   :  { %1912 = vmatpush3.bf16.msra.mxu1 %v2471_v31  ;;  %1833 = vmatprep.mubr.msk.f32.mxu1 %vm2234_vm0, %v2235_v2 }
 0x34a   :  { %1913 = vmatprep.subr.bf16.mxu1 %v2233_v1 }
 0x34b   :  { %v404_v36 = vpop.permute.xlu1 %403 }
 0x34c   :  { %406 = vst.msk [vmem:[#allocation4] sm:$0xff] %vm156_vm1, %v404_v36  ;;  %1801 = vmatmul.mubr.msk.f32.vlgmr.msra.gmra.mrb[2].mxu0 %vm156_vm1, %v404_v36 }
 0x34d   :  { %1906 = vmatpush3.bf16.msra.mxu0 %v2443_v20  ;;  %1915 = vmatpush3.bf16.msra.mxu1 %v2484_v34 }
 0x34e   :  { %1907 = vmatprep.subr.bf16.mxu0 %v2233_v1  ;;  %1822 = vmatprep.mubr.msk.f32.mxu0 %vm2234_vm0, %v2235_v2 }
 0x34f   :  { %1922 = vmatprep.subr.bf16.mxu1 %v2233_v1 }
 0x351   :  { %1909 = vmatpush3.bf16.msra.mxu0 %v2449_v26 }
 0x352   :  { %1916 = vmatprep.subr.bf16.mxu0 %v2233_v1 }
 0x41b   :  { %v697_v37 = vpop.f32.mrb[10].mxu1 }
 0x41c   :  { %v708_v38 = vadd.f32 %v697_v37, %v2510_v55  ;;  %v1813_v39 = vpop.f32.mrb[11].mxu1  ;;  %v701_v44 = vadd.f32 %v697_v37, %v628_v43 }
 0x41e   :  { %710 = vrot.lane.b32.xlu0 %v708_v38, %s2236_s20  ;;  %v1676_v46 = vmul.f32 -1.442695, %v701_v44 }
 0x41f   :  { %v590_v40 = vpop.f32.mrb[2].mxu0 }
 0x420   :  { %v601_v41 = vadd.f32 %v590_v40, %v2512_v57  ;;  %v1802_v42 = vpop.f32.mrb[3].mxu0  ;;  %v594_v47 = vadd.f32 %v590_v40, %v521_v45  ;;  %1975 = vpow2.f32 %v1676_v46 }
 0x422   :  { %603 = vrot.lane.b32.xlu0 %v601_v41, %s2236_s20  ;;  %v1674_v48 = vmul.f32 -1.442695, %v594_v47 }
 0x424   :  { %1977 = vpow2.f32 %v1674_v48 }
 0x42a   :  { %v1976_v49 = vpop.eup %1975 }
 0x42b   :  { %v705_v50 = vadd.f32 1.0, %v1976_v49 }
 0x42d   :  { %1979 = vrcp.f32 %v705_v50 }
 0x42e   :  { %v1978_v51 = vpop.eup %1977 }
 0x42f   :  { %v598_v52 = vadd.f32 1.0, %v1978_v51 }
 0x431   :  { %1981 = vrcp.f32 %v598_v52 }
 0x437   :  { %v1980_v53 = vpop.eup %1979 }
 0x438   :  { %v720_v5 = vsub.f32 1.0, %v1980_v53  ;;  %v726_v7 = vmul.f32 %v1980_v53, %v2522_v27 }
 0x43b   :  { %v1982_v58 = vpop.eup %1981 }
 0x43c   :  { %v613_v10 = vsub.f32 1.0, %v1982_v58  ;;  %v619_v12 = vmul.f32 %v1982_v58, %v2526_v33 }
 0x490   :  { %v711_v54 = vpop.permute.xlu0 %710 }
 0x491   :  { %v713_v56 = vmul.f32 %v1980_v53, %v711_v54 }
 0x493   :  { %715 = vrot.lane.b32.xlu1 %v713_v56, %s2236_s20 }
 0x494   :  { %v604_v59 = vpop.permute.xlu0 %603 }
 0x495   :  { %v606_v60 = vmul.f32 %v1982_v58, %v604_v59 }
 0x497   :  { %608 = vrot.lane.b32.xlu1 %v606_v60, %s2236_s20 }
 0x505   :  { %v716_v61 = vpop.permute.xlu1 %715 }
 0x506   :  { %v718_v62 = vadd.f32 %v716_v61, %v628_v43 }
 0x508   :  { %1983 = vtanh.f32 %v718_v62 }
 0x509   :  { %v609_v63 = vpop.permute.xlu1 %608 }
 0x50a   :  { %v611_v0 = vadd.f32 %v609_v63, %v521_v45  ;;  %v1055_v63 = vld [vmem:[#allocation3] sm:$0xff] }
 0x50c   :  { %1985 = vtanh.f32 %v611_v0 }
 0x512   :  { %v1984_v3 = vpop.eup %1983 }
 0x513   :  { %722 = vrot.lane.b32.xlu0 %v1984_v3, %s2237_s7  ;;  %v949_v3 = vld [vmem:[#allocation2 + $0x18] sm:$0xff] }
 0x516   :  { %v1986_v4 = vpop.eup %1985 }
 0x517   :  { %615 = vrot.lane.b32.xlu0 %v1986_v4, %s2237_s7 }
 0x585   :  { %v723_v6 = vpop.permute.xlu0 %722 }
 0x586   :  { %v725_v8 = vmul.f32 %v723_v6, %v720_v5 }
 0x588   :  { %v2555_v9 = vadd.f32 %v726_v7, %v725_v8 }
 0x589   :  { %v616_v11 = vpop.permute.xlu0 %615 }
 0x58a   :  { %v618_v13 = vmul.f32 %v616_v11, %v613_v10  ;;  %729 = vrot.lane.b32.xlu1 %v2555_v9, %s2237_s7 }
 0x58c   :  { %v2560_v14 = vadd.f32 %v619_v12, %v618_v13 }
 0x58e   :  { %622 = vrot.lane.b32.xlu1 %v2560_v14, %s2237_s7 }
 0x5fc   :  { %v730_v15 = vpop.permute.xlu1 %729 }
 0x5fd   :  { %733 = vst.msk [vmem:[#allocation5 + $0x10] sm:$0xff] %vm156_vm1, %v730_v15  ;;  %1834 = vmatmul.mubr.msk.f32.vlgmr.msra.gmra.mrb[12].mxu1 %vm156_vm1, %v730_v15 }
 0x5fe   :  { %1924 = vmatpush3.bf16.msra.mxu1 %v2471_v31  ;;  %1855 = vmatprep.mubr.msk.f32.mxu1 %vm2234_vm0, %v2235_v2 }
 0x5ff   :  { %1925 = vmatprep.subr.bf16.mxu1 %v2233_v1 }
 0x600   :  { %v623_v16 = vpop.permute.xlu1 %622 }
 0x601   :  { %626 = vst.msk [vmem:[#allocation4 + $0x8] sm:$0xff] %vm156_vm1, %v623_v16  ;;  %1823 = vmatmul.mubr.msk.f32.vlgmr.msra.gmra.mrb[4].mxu0 %vm156_vm1, %v623_v16 }
 0x602   :  { %1918 = vmatpush3.bf16.msra.mxu0 %v2443_v20  ;;  %1927 = vmatpush3.bf16.msra.mxu1 %v2484_v34  ;;  %v842_v20 = vld [vmem:[#allocation3 + $0x8] sm:$0xff] }
 0x603   :  { %1919 = vmatprep.subr.bf16.mxu0 %v2233_v1  ;;  %1844 = vmatprep.mubr.msk.f32.mxu0 %vm2234_vm0, %v2235_v2  ;;  %v735_v1 = vld [vmem:[#allocation2 + $0x10] sm:$0xff] }
 0x606   :  { %1921 = vmatpush3.bf16.msra.mxu0 %v2449_v26 }
 0x6d0   :  { %v911_v31 = vpop.f32.mrb[12].mxu1 }
 0x6d1   :  { %v922_v17 = vadd.f32 %v911_v31, %v2510_v55  ;;  %v1835_v18 = vpop.f32.mrb[13].mxu1  ;;  %v915_v34 = vadd.f32 %v911_v31, %v842_v20 }
 0x6d3   :  { %924 = vrot.lane.b32.xlu0 %v922_v17, %s2236_s20  ;;  %v1680_v23 = vmul.f32 -1.442695, %v915_v34 }
 0x6d4   :  { %v804_v19 = vpop.f32.mrb[4].mxu0 }
 0x6d5   :  { %v815_v21 = vadd.f32 %v804_v19, %v2512_v57  ;;  %v1824_v22 = vpop.f32.mrb[5].mxu0  ;;  %v808_v24 = vadd.f32 %v804_v19, %v735_v1  ;;  %1987 = vpow2.f32 %v1680_v23 }
 0x6d7   :  { %817 = vrot.lane.b32.xlu0 %v815_v21, %s2236_s20  ;;  %v1678_v2 = vmul.f32 -1.442695, %v808_v24 }
 0x6d9   :  { %1989 = vpow2.f32 %v1678_v2 }
 0x6df   :  { %v1988_v26 = vpop.eup %1987 }
 0x6e0   :  { %v919_v25 = vadd.f32 1.0, %v1988_v26 }
 0x6e2   :  { %1991 = vrcp.f32 %v919_v25 }
 0x6e3   :  { %v1990_v27 = vpop.eup %1989 }
 0x6e4   :  { %v812_v28 = vadd.f32 1.0, %v1990_v27 }
 0x6e6   :  { %1993 = vrcp.f32 %v812_v28  ;;  %v1167_v28 = vld [vmem:[#allocation5 + $0x18] sm:$0xff] }
 0x6ec   :  { %v1992_v29 = vpop.eup %1991 }
 0x6ed   :  { %v934_v43 = vsub.f32 1.0, %v1992_v29  ;;  %v940_v45 = vmul.f32 %v1992_v29, %v2555_v9 }
 0x6f0   :  { %v1994_v33 = vpop.eup %1993 }
 0x6f1   :  { %v827_v48 = vsub.f32 1.0, %v1994_v33  ;;  %v833_v50 = vmul.f32 %v1994_v33, %v2560_v14 }
 0x745   :  { %v925_v30 = vpop.permute.xlu0 %924 }
 0x746   :  { %v927_v32 = vmul.f32 %v1992_v29, %v925_v30 }
 0x748   :  { %929 = vrot.lane.b32.xlu1 %v927_v32, %s2236_s20 }
 0x749   :  { %v818_v35 = vpop.permute.xlu0 %817 }
 0x74a   :  { %v820_v36 = vmul.f32 %v1994_v33, %v818_v35  ;;  %v1161_v35 = vld [vmem:[#allocation4 + $0x8] sm:$0xff] }
 0x74c   :  { %822 = vrot.lane.b32.xlu1 %v820_v36, %s2236_s20 }
 0x7ba   :  { %v930_v37 = vpop.permute.xlu1 %929 }
 0x7bb   :  { %v932_v38 = vadd.f32 %v930_v37, %v842_v20 }
 0x7bd   :  { %1995 = vtanh.f32 %v932_v38  ;;  %v1166_v38 = vld [vmem:[#allocation5 + $0x10] sm:$0xff] }
 0x7be   :  { %v823_v39 = vpop.permute.xlu1 %822 }
 0x7bf   :  { %v825_v40 = vadd.f32 %v823_v39, %v735_v1 }
 0x7c1   :  { %1997 = vtanh.f32 %v825_v40  ;;  %v1160_v40 = vld [vmem:[#allocation4] sm:$0xff] }
 0x7c7   :  { %v1996_v41 = vpop.eup %1995 }
 0x7c8   :  { %936 = vrot.lane.b32.xlu0 %v1996_v41, %s2237_s7 }
 0x7cb   :  { %v1998_v42 = vpop.eup %1997 }
 0x7cc   :  { %829 = vrot.lane.b32.xlu0 %v1998_v42, %s2237_s7 }
 0x83a   :  { %v937_v44 = vpop.permute.xlu0 %936 }
 0x83b   :  { %v939_v46 = vmul.f32 %v937_v44, %v934_v43 }
 0x83d   :  { %v941_v47 = vadd.f32 %v940_v45, %v939_v46 }
 0x83e   :  { %v830_v49 = vpop.permute.xlu0 %829 }
 0x83f   :  { %v832_v51 = vmul.f32 %v830_v49, %v827_v48  ;;  %943 = vrot.lane.b32.xlu1 %v941_v47, %s2237_s7 }
 0x841   :  { %v834_v52 = vadd.f32 %v833_v50, %v832_v51 }
 0x843   :  { %836 = vrot.lane.b32.xlu1 %v834_v52, %s2237_s7 }
 0x8b1   :  { %v944_v53 = vpop.permute.xlu1 %943 }
 0x8b2   :  { %947 = vst.msk [vmem:[#allocation5 + $0x8] sm:$0xff] %vm156_vm1, %v944_v53  ;;  %1856 = vmatmul.mubr.msk.f32.vlgmr.msra.gmra.mrb[14].mxu1 %vm156_vm1, %v944_v53 }
 0x8b5   :  { %v837_v54 = vpop.permute.xlu1 %836 }
 0x8b6   :  { %840 = vst.msk [vmem:[#allocation4 + $0x10] sm:$0xff] %vm156_vm1, %v837_v54  ;;  %1845 = vmatmul.mubr.msk.f32.vlgmr.msra.gmra.mrb[6].mxu0 %vm156_vm1, %v837_v54 }
 0x8b9   :  { %v1165_v27 = vld [vmem:[#allocation5 + $0x8] sm:$0xff] }
 0x8bd   :  { %v1162_v45 = vld [vmem:[#allocation4 + $0x10] sm:$0xff] }
 0x985   :  { %v1124_v56 = vpop.f32.mrb[14].mxu1 }
 0x986   :  { %v1135_v58 = vadd.f32 %v1124_v56, %v2510_v55  ;;  %v1857_v59 = vpop.f32.mrb[15].mxu1  ;;  %v1128_v0 = vadd.f32 %v1124_v56, %v1055_v63 }
 0x988   :  { %1137 = vrot.lane.b32.xlu0 %v1135_v58, %s2236_s20  ;;  %v1684_v4 = vmul.f32 -1.442695, %v1128_v0 }
 0x989   :  { %v1018_v60 = vpop.f32.mrb[6].mxu0 }
 0x98a   :  { %v1029_v61 = vadd.f32 %v1018_v60, %v2512_v57  ;;  %v1846_v62 = vpop.f32.mrb[7].mxu0  ;;  %v1022_v5 = vadd.f32 %v1018_v60, %v949_v3  ;;  %1999 = vpow2.f32 %v1684_v4 }
 0x98c   :  { %1031 = vrot.lane.b32.xlu0 %v1029_v61, %s2236_s20  ;;  %v1682_v6 = vmul.f32 -1.442695, %v1022_v5 }
 0x98e   :  { %2001 = vpow2.f32 %v1682_v6 }
 0x994   :  { %v2000_v7 = vpop.eup %1999 }
 0x995   :  { %v1132_v8 = vadd.f32 1.0, %v2000_v7 }
 0x997   :  { %2003 = vrcp.f32 %v1132_v8 }
 0x998   :  { %v2002_v55 = vpop.eup %2001 }
 0x999   :  { %v1026_v9 = vadd.f32 1.0, %v2002_v55 }
 0x99b   :  { %2005 = vrcp.f32 %v1026_v9 }
 0x9a1   :  { %v2004_v10 = vpop.eup %2003 }
 0x9a2   :  { %v1147_v21 = vsub.f32 1.0, %v2004_v10  ;;  %v1153_v20 = vmul.f32 %v2004_v10, %v941_v47 }
 0x9a5   :  { %v2006_v12 = vpop.eup %2005 }
 0x9a6   :  { %v1041_v23 = vsub.f32 1.0, %v2006_v12  ;;  %v1047_v2 = vmul.f32 %v2006_v12, %v834_v52 }
 0x9fa   :  { %v1138_v11 = vpop.permute.xlu0 %1137 }
 0x9fb   :  { %v1140_v57 = vmul.f32 %v2004_v10, %v1138_v11  ;;  %v1264_v10 = vld [vmem:[#allocation16] sm:$0xff]  ;;  %v1265_v11 = vld [vmem:[#allocation16 + $0x8] sm:$0xff] }
 0x9fd   :  { %1142 = vrot.lane.b32.xlu1 %v1140_v57, %s2236_s20  ;;  %v1928_v57 = vpack.c.bf16 %v1265_v11, %v1264_v10  ;;  %v1693_v11 = vld [vmem:[#allocation6] ss:$0 sm:$0xff] }
 0x9fe   :  { %v1032_v13 = vpop.permute.xlu0 %1031 }
 0x9ff   :  { %v1034_v14 = vmul.f32 %v2006_v12, %v1032_v13  ;;  %1929 = vmatprep.subr.bf16.mxu0 %v1928_v57  ;;  %v1266_v12 = vld [vmem:[#allocation16 + $0x10] sm:$0xff]  ;;  %v1267_v13 = vld [vmem:[#allocation16 + $0x18] sm:$0xff] }
 0xa00   :  { %1931 = vmatpush3.bf16.msra.mxu0 %v1928_v57  ;;  %v1421_v57 = vlaneseq }
 0xa01   :  { %1036 = vrot.lane.b32.xlu1 %v1034_v14, %s2236_s20  ;;  %v1932_v14 = vpack.c.bf16 %v1267_v13, %v1266_v12 }
 0xa02   :  { %v1422_v13 = vand.u32 127, %v1421_v57 }
 0xa03   :  { %1933 = vmatprep.subr.bf16.mxu0 %v1932_v14 }
 0xa04   :  { %1935 = vmatpush3.bf16.msra.mxu0 %v1932_v14  ;;  %v2650_v14 = vshrl.u32 %v1421_v57, 7 }
 0xa6f   :  { %v1143_v15 = vpop.permute.xlu1 %1142 }
 0xa70   :  { %v1145_v16 = vadd.f32 %v1143_v15, %v1055_v63  ;;  %v1268_v15 = vld [vmem:[#allocation16 + $0x20] sm:$0xff] }
 0xa72   :  { %2007 = vtanh.f32 %v1145_v16  ;;  %v1269_v16 = vld [vmem:[#allocation16 + $0x28] sm:$0xff] }
 0xa73   :  { %v1037_v31 = vpop.permute.xlu1 %1036 }
 0xa74   :  { %v1039_v17 = vadd.f32 %v1037_v31, %v949_v3  ;;  %v1936_v31 = vpack.c.bf16 %v1269_v16, %v1268_v15 }
 0xa76   :  { %2009 = vtanh.f32 %v1039_v17  ;;  %v1270_v17 = vld [vmem:[#allocation16 + $0x30] sm:$0xff]  ;;  %1937 = vmatprep.subr.bf16.mxu0 %v1936_v31 }
 0xa77   :  { %1939 = vmatpush3.bf16.msra.mxu0 %v1936_v31  ;;  %v2653_v31 = vsub.s32 %v1422_v13, %v2650_v14 }
 0xa7c   :  { %v2008_v18 = vpop.eup %2007 }
 0xa7d   :  { %1149 = vrot.lane.b32.xlu0 %v2008_v18, %s2237_s7  ;;  %v1271_v18 = vld [vmem:[#allocation16 + $0x38] sm:$0xff] }
 0xa80   :  { %v2010_v19 = vpop.eup %2009 }
 0xa81   :  { %1043 = vrot.lane.b32.xlu0 %v2010_v19, %s2237_s7  ;;  %v1940_v19 = vpack.c.bf16 %v1271_v18, %v1270_v17 }
 0xa83   :  { %1941 = vmatprep.subr.bf16.mxu0 %v1940_v19 }
 0xa84   :  { %1943 = vmatpush3.bf16.msra.mxu0 %v1940_v19 }
 0xaef   :  { %v1150_v22 = vpop.permute.xlu0 %1149 }
 0xaf0   :  { %v1152_v34 = vmul.f32 %v1150_v22, %v1147_v21 }
 0xaf2   :  { %v1154_v1 = vadd.f32 %v1153_v20, %v1152_v34 }
 0xaf3   :  { %v1044_v24 = vpop.permute.xlu0 %1043 }
 0xaf4   :  { %v1046_v26 = vmul.f32 %v1044_v24, %v1041_v23  ;;  %1156 = vrot.lane.b32.xlu1 %v1154_v1, %s2237_s7 }
 0xaf6   :  { %v1048_v25 = vadd.f32 %v1047_v2, %v1046_v26 }
 0xaf8   :  { %1050 = vrot.lane.b32.xlu1 %v1048_v25, %s2237_s7 }
 0xafc   :  { %1174 = vrot.lane.b32.xlu1 %v1165_v27, %s2238_s21 }
 0xb00   :  { %1178 = vrot.lane.b32.xlu1 %v1167_v28, %s2238_s21 }
 0xb66   :  { %v1157_v29 = vpop.permute.xlu1 %1156 }
 0xb67   :  { %1159 = vst.msk [vmem:[#allocation5] sm:$0xff] %vm156_vm1, %v1157_v29 }
 0xb6a   :  { %v1051_v30 = vpop.permute.xlu1 %1050 }
 0xb6b   :  { %1054 = vst.msk [vmem:[#allocation4 + $0x18] sm:$0xff] %vm156_vm1, %v1051_v30 }
 0xb6e   :  { %v1175_v32 = vpop.permute.xlu1 %1174  ;;  %v1164_v33 = vld [vmem:[#allocation5] sm:$0xff] }
 0xb6f   :  { %1172 = vrot.lane.b32.xlu0 %v1164_v33, %s2238_s21  ;;  %v1185_v36 = vsel %vm156_vm1, %v1161_v35, %v1175_v32  ;;  %v1685_v32 = vld [vmem:[%s2727_s9] ss:$0 sm:$0xff] }
 0xb70   :  { %v1192_v37 = vsel %vm1188_vm3, %v1185_v36, 0.0 }
 0xb71   :  { %1193 = vadd.xlane.f32.xlu1 %v1192_v37 }
 0xb72   :  { %v1179_v43 = vpop.permute.xlu1 %1178  ;;  %v1163_v46 = vld [vmem:[#allocation4 + $0x18] sm:$0xff] }
 0xb73   :  { %1176 = vrot.lane.b32.xlu0 %v1166_v38, %s2238_s21  ;;  %v1187_v49 = vsel %vm156_vm1, %v1163_v46, %v1179_v43  ;;  %v1686_v38 = vld [vmem:[%s2728_s10] ss:$0 sm:$0xff] }
 0xb74   :  { %v1198_v50 = vsel %vm1188_vm3, %v1187_v49, 0.0 }
 0xbe1   :  { %v1173_v39 = vpop.permute.xlu0 %1172 }
 0xbe2   :  { %v1184_v41 = vsel %vm156_vm1, %v1160_v40, %v1173_v39 }
 0xbe3   :  { %v1189_v42 = vsel %vm1188_vm3, %v1184_v41, 0.0 }
 0xbe4   :  { %1190 = vadd.xlane.f32.xlu0 %v1189_v42 }
 0xbe5   :  { %v1177_v44 = vpop.permute.xlu0 %1176 }
 0xbe6   :  { %v1186_v47 = vsel %vm156_vm1, %v1162_v45, %v1177_v44 }
 0xbe7   :  { %v1195_v48 = vsel %vm1188_vm3, %v1186_v47, 0.0 }
 0xbe8   :  { %1196 = vadd.xlane.f32.xlu0 %v1195_v48 }
 0xbec   :  { %1199 = vadd.xlane.f32.xlu0 %v1198_v50  ;;  %v1687_v50 = vld [vmem:[%s2730_s12] ss:$0 sm:$0xff]  ;;  %s2240_s12 = smov [#allocation19]  }
 0xbfe   :  { %v1194_v51 = vpop.xlane.xlu1 %1193 }
 0xbff   :  { %v1203_v52 = vmul.f32 0.015625, %v1194_v51 }
 0xc01   :  { %v1207_v53 = vsub.f32 %v1185_v36, %v1203_v52 }
 0xc03   :  { %v1211_v54 = vmul.f32 %v1207_v53, %v1207_v53 }
 0xc05   :  { %v1217_v56 = vsel %vm1188_vm3, %v1211_v54, 0.0 }
 0xc06   :  { %1218 = vadd.xlane.f32.xlu0 %v1217_v56 }
 0xc71   :  { %v1191_v58 = vpop.xlane.xlu0 %1190 }
 0xc72   :  { %v1202_v59 = vmul.f32 0.015625, %v1191_v58 }
 0xc74   :  { %v1206_v60 = vsub.f32 %v1184_v41, %v1202_v59 }
 0xc75   :  { %v1197_v61 = vpop.xlane.xlu0 %1196 }
 0xc76   :  { %v1204_v62 = vmul.f32 0.015625, %v1197_v61  ;;  %v1210_v63 = vmul.f32 %v1206_v60, %v1206_v60  ;;  %v1692_v61 = vld [vmem:[%s2731_s13] ss:$0 sm:$0xff]  ;;  %s1647_s13 = sshll.u32 %s2240_s12, 4  ;;  %s1648_s13 = int_to_ptr.vmem [resolvable:$true] %s1647_s13 }
 0xc77   :  { %s2169_s5 = scalar_lea.vmem %s1648_s13, 64  ;;  %p2174_p7 = scmp.lt.s32.totalorder %s1648_s13, %s1648_s13 }
 0xc78   :  { %v1208_v0 = vsub.f32 %v1186_v47, %v1204_v62  ;;  %v1214_v3 = vsel %vm1188_vm3, %v1210_v63, 0.0  ;;  %p2170_p6 = scmp.ne.s32.totalorder %s1648_s13, %s2169_s5  ;;  %p2175_p8 = scmp.lt.s32.totalorder %s2169_s5, %s2169_s5 }
 0xc79   :  { %1215 = vadd.xlane.f32.xlu1 %v1214_v3  ;;  %v1200_v4 = vpop.xlane.xlu0 %1199 }
 0xc7a   :  { %v1205_v5 = vmul.f32 0.015625, %v1200_v4  ;;  %v1212_v6 = vmul.f32 %v1208_v0, %v1208_v0  ;;  %p2176_p9 = por %p2175_p8, %p2174_p7 }
 0xc7c   :  { %v1209_v7 = vsub.f32 %v1187_v49, %v1205_v5  ;;  %v1220_v8 = vsel %vm1188_vm3, %v1212_v6, 0.0  ;;  %v2239_v49 = vmov 0   ;;  %p2177_p10 = pnand %p2176_p9, %p2170_p6 }
 0xc7d   :  { %1221 = vadd.xlane.f32.xlu1 %v1220_v8  ;;  %1962 = vset.pattern.permute.xlu0 %v2239_v49 }
 0xc7e   :  { %v1213_v55 = vmul.f32 %v1209_v7, %v1209_v7  ;;  %1961 = vset.pattern.permute.xlu1 %v2239_v49 }
 0xc80   :  { %v1223_v9 = vsel %vm1188_vm3, %v1213_v55, 0.0 }
 0xc81   :  { %1224 = vadd.xlane.f32.xlu0 %v1223_v9 }
 0xc93   :  { %v1219_v21 = vpop.xlane.xlu0 %1218 }
 0xc94   :  { %v1227_v22 = vmul.f32 0.015625, %v1219_v21 }
 0xc96   :  { %v1231_v20 = vadd.f32 1e-05, %v1227_v22 }
 0xc98   :  { %2011 = vrsqrt.f32 %v1231_v20 }
 0xca2   :  { %v2012_v28 = vpop.eup %2011 }
 0xca3   :  { %v1239_v30 = vmul.f32 %v2012_v28, %v1207_v53  ;;  %v1453_v28 = vsub.s32 0, %v2650_v14 }
 0xca5   :  { %v1250_v36 = vmul.f32 %v1685_v32, %v1239_v30  ;;  %v1461_v30 = vsub.s32 2, %v2650_v14 }
 0xca7   :  { %v2626_v42 = vadd.f32 %v1686_v38, %v1250_v36 }
 0xd06   :  { %v1216_v34 = vpop.xlane.xlu1 %1215 }
 0xd07   :  { %v1226_v1 = vmul.f32 0.015625, %v1216_v34 }
 0xd09   :  { %v1230_v23 = vadd.f32 1e-05, %v1226_v1 }
 0xd0a   :  { %v1222_v24 = vpop.xlane.xlu1 %1221 }
 0xd0b   :  { %2013 = vrsqrt.f32 %v1230_v23  ;;  %v1228_v2 = vmul.f32 0.015625, %v1222_v24 }
 0xd0d   :  { %v1232_v26 = vadd.f32 1e-05, %v1228_v2 }
 0xd0e   :  { %v1225_v25 = vpop.xlane.xlu0 %1224 }
 0xd0f   :  { %2015 = vrsqrt.f32 %v1232_v26  ;;  %v1229_v27 = vmul.f32 0.015625, %v1225_v25 }
 0xd11   :  { %v1233_v29 = vadd.f32 1e-05, %v1229_v27 }
 0xd13   :  { %2017 = vrsqrt.f32 %v1233_v29  ;;  %v1457_v29 = vsub.s32 1, %v2650_v14 }
 0xd15   :  { %v2014_v33 = vpop.eup %2013 }
 0xd16   :  { %v1238_v35 = vmul.f32 %v2014_v33, %v1206_v60 }
 0xd18   :  { %v1249_v37 = vmul.f32 %v1685_v32, %v1238_v35 }
 0xd19   :  { %v2016_v39 = vpop.eup %2015 }
 0xd1a   :  { %v2624_v40 = vadd.f32 %v1686_v38, %v1249_v37  ;;  %v1240_v41 = vmul.f32 %v2016_v39, %v1208_v0 }
 0xd1c   :  { %1874 = vmatprep.mubr.msk.f32.mxu0 %vm1188_vm3, %v2624_v40  ;;  %v1251_v43 = vmul.f32 %v1685_v32, %v1240_v41 }
 0xd1d   :  { %v2018_v44 = vpop.eup %2017  ;;  %1875 = vmatmul.mubr.msk.f32.vlgmr.msra.gmra.mrb[8].mxu0 %vm1188_vm3, %v2626_v42 }
 0xd1e   :  { %v2632_v45 = vadd.f32 %v1686_v38, %v1251_v43  ;;  %v1241_v46 = vmul.f32 %v2018_v44, %v1209_v7 }
 0xd20   :  { %1877 = vmatprep.mubr.msk.f32.mxu0 %vm1188_vm3, %v2632_v45  ;;  %v1252_v47 = vmul.f32 %v1685_v32, %v1241_v46  ;;  %v1465_v32 = vsub.s32 3, %v2650_v14 }
 0xd22   :  { %v2636_v48 = vadd.f32 %v1686_v38, %v1252_v47 }
 0xd24   :  { %1878 = vmatmul.mubr.msk.f32.gmra.mrb[10].mxu0 %vm1188_vm3, %v2636_v48 }
 0xdf0   :  { %v1876_v51 = vpop.f32.mrb[8].mxu0 }
 0xdf1   :  { %v1363_v52 = vadd.f32 %v1876_v51, %v1687_v50  ;;  %v1357_v53 = vpop.f32.mrb[9].mxu0 }
 0xdf2   :  { %v1358_v54 = vadd.f32 %v1687_v50, %v1357_v53 }
 0xdf3   :  { %2019 = vtanh.f32 %v1363_v52 }
 0xdf4   :  { %2021 = vtanh.f32 %v1358_v54 }
 0xdf7   :  { %v1879_v56 = vpop.f32.mrb[10].mxu0 }
 0xdf8   :  { %v1373_v58 = vadd.f32 %v1879_v56, %v1687_v50  ;;  %v1367_v59 = vpop.f32.mrb[11].mxu0 }
 0xdf9   :  { %v1368_v60 = vadd.f32 %v1687_v50, %v1367_v59 }
 0xdfa   :  { %2023 = vtanh.f32 %v1373_v58 }
 0xdfb   :  { %2025 = vtanh.f32 %v1368_v60 }
 0xdfd   :  { %v2020_v62 = vpop.eup %2019 }
 0xdfe   :  { %v2022_v63 = vpop.eup %2021  ;;  %v1388_v0 = vmul.f32 %v2020_v62, %v1692_v61 }
 0xdff   :  { %v1387_v3 = vmul.f32 %v2022_v63, %v1692_v61 }
 0xe00   :  { %v1394_v4 = vsel %vm156_vm1, %v1388_v0, 0.0 }
 0xe01   :  { %1395 = vadd.xlane.f32.xlu0 %v1394_v4  ;;  %v1391_v5 = vsel %vm156_vm1, %v1387_v3, 0.0 }
 0xe02   :  { %1392 = vadd.xlane.f32.xlu1 %v1391_v5 }
 0xe04   :  { %v2024_v6 = vpop.eup %2023 }
 0xe05   :  { %v2026_v7 = vpop.eup %2025  ;;  %v1390_v8 = vmul.f32 %v2024_v6, %v1692_v61 }
 0xe06   :  { %v1389_v55 = vmul.f32 %v2026_v7, %v1692_v61 }
 0xe07   :  { %v1400_v9 = vsel %vm156_vm1, %v1390_v8, 0.0 }
 0xe08   :  { %1401 = vadd.xlane.f32.xlu0 %v1400_v9  ;;  %v1397_v10 = vsel %vm156_vm1, %v1389_v55, 0.0 }
 0xe09   :  { %1398 = vadd.xlane.f32.xlu1 %v1397_v10 }
 0xe1a   :  { %1410 = vperm.xlu1 %1961, %v1693_v11  }
 0xe8e   :  { %v1396_v15 = vpop.xlane.xlu0 %1395 }
 0xe8f   :  { %v1393_v12 = vpop.xlane.xlu1 %1392 }
 0xe95   :  { %v1402_v17 = vpop.xlane.xlu0 %1401 }
 0xe96   :  { %v1399_v16 = vpop.xlane.xlu1 %1398 }
 0xe9a   :  { %v1411_v18 = vpop.permute.xlu1 %1410 }
 0xe9b   :  { %v1413_v19 = vadd.f32 %v1411_v18, %v1393_v12  ;;  %v1414_v21 = vadd.f32 %v1411_v18, %v1396_v15  ;;  %v1415_v22 = vadd.f32 %v1411_v18, %v1399_v16  ;;  %v1416_v20 = vadd.f32 %v1411_v18, %v1402_v17 }
 0xe9d   :  { %v1426_v34 = vrot.slane %v1413_v19, %v2653_v31  ;;  %v1430_v1 = vrot.slane %v1414_v21, %v2653_v31  ;;  %v1434_v23 = vrot.slane %v1415_v22, %v2653_v31  ;;  %v1438_v24 = vrot.slane %v1416_v20, %v2653_v31 }
 0xe9f   :  { %v1440_v2 = vsel %vm1439_vm4, %v1430_v1, %v1426_v34 }
 0xea0   :  { %v1442_v26 = vsel %vm1441_vm5, %v1434_v23, %v1440_v2 }
 0xea1   :  { %v1444_v25 = vsel %vm1443_vm6, %v1438_v24, %v1442_v26 }
 0xea2   :  { %v1447_v27 = vsel %vm1446_vm7, %v1444_v25, -inf }
 0xea3   :  { %1448 = vmax.xlane.f32.xlu0 %v1447_v27 }
 0xf30   :  { %v1449_v33 = vpop.xlane.xlu0 %1448 }
 0xf31   :  { %v1454_v35 = vrot.slane %v1449_v33, %v1453_v28  ;;  %v1458_v36 = vrot.slane %v1449_v33, %v1457_v29  ;;  %v1462_v37 = vrot.slane %v1449_v33, %v1461_v30  ;;  %v1466_v41 = vrot.slane %v1449_v33, %v1465_v32 }
 0xf33   :  { %v1471_v38 = vsub.f32 %v1413_v19, %v1454_v35  ;;  %v1472_v39 = vsub.f32 %v1414_v21, %v1458_v36  ;;  %v1473_v43 = vsub.f32 %v1415_v22, %v1462_v37  ;;  %v1474_v47 = vsub.f32 %v1416_v20, %v1466_v41 }
 0xf35   :  { %v1475_v44 = vmul.f32 1.442695, %v1471_v38  ;;  %v1477_v46 = vmul.f32 1.442695, %v1472_v39  ;;  %v1479_v49 = vmul.f32 1.442695, %v1473_v43 }
 0xf36   :  { %v1481_v50 = vmul.f32 1.442695, %v1474_v47 }
 0xf37   :  { %2027 = vpow2.f32 %v1475_v44 }
 0xf38   :  { %2029 = vpow2.f32 %v1477_v46 }
 0xf39   :  { %2031 = vpow2.f32 %v1479_v49 }
 0xf3a   :  { %2033 = vpow2.f32 %v1481_v50 }
 0xf41   :  { %v2028_v51 = vpop.eup %2027 }
 0xf42   :  { %v2030_v52 = vpop.eup %2029  ;;  %1488 = vperm.xlu0 %1962, %v2028_v51  }
 0xf43   :  { %1491 = vperm.xlu1 %1961, %v2030_v52   ;;  %v2032_v53 = vpop.eup %2031 }
 0xf44   :  { %v2034_v54 = vpop.eup %2033 }
 0xf47   :  { %1494 = vperm.xlu1 %1961, %v2032_v53  }
 0xf4b   :  { %1497 = vperm.xlu1 %1961, %v2034_v54  }
 0xfc1   :  { %v1489_v58 = vpop.permute.xlu0 %1488 }
 0xfc2   :  { %v1492_v56 = vpop.permute.xlu1 %1491  ;;  %v1502_v61 = vrot.slane %v1489_v58, %v2653_v31 }
 0xfc3   :  { %v1506_v60 = vrot.slane %v1492_v56, %v2653_v31 }
 0xfc5   :  { %v1515_v0 = vsel %vm1439_vm4, %v1506_v60, %v1502_v61 }
 0xfc6   :  { %v1495_v59 = vpop.permute.xlu1 %1494 }
 0xfc7   :  { %v1510_v62 = vrot.slane %v1495_v59, %v2653_v31 }
 0xfc9   :  { %v1516_v4 = vsel %vm1441_vm5, %v1510_v62, %v1515_v0 }
 0xfca   :  { %v1498_v63 = vpop.permute.xlu1 %1497 }
 0xfcb   :  { %v1514_v3 = vrot.slane %v1498_v63, %v2653_v31 }
 0xfcd   :  { %v1517_v5 = vsel %vm1443_vm6, %v1514_v3, %v1516_v4 }
 0xfce   :  { %v1519_v6 = vsel %vm1446_vm7, %v1517_v5, 0.0 }
 0xfcf   :  { %1520 = vadd.xlane.f32.xlu1 %v1519_v6 }
0x105c   :  { %v1521_v7 = vpop.xlane.xlu1 %1520 }
0x105d   :  { %2035 = vrcp.f32 %v1521_v7 }
0x1067   :  { %v2036_v8 = vpop.eup %2035 }
0x1068   :  { %v1527_v55 = vrot.slane %v2036_v8, %v1453_v28  ;;  %v1531_v10 = vrot.slane %v2036_v8, %v1457_v29  ;;  %v1535_v57 = vrot.slane %v2036_v8, %v1461_v30  ;;  %v1539_v13 = vrot.slane %v2036_v8, %v1465_v32 }
0x106a   :  { %v1544_v9 = vmul.f32 %v2028_v51, %v1527_v55  ;;  %v1545_v11 = vmul.f32 %v2030_v52, %v1531_v10  ;;  %v1546_v12 = vmul.f32 %v2032_v53, %v1535_v57  ;;  %v1547_v14 = vmul.f32 %v2034_v54, %v1539_v13 }
0x106c   :  { %1550 = vperm.xlu0 %1962, %v1544_v9  }
0x1070   :  { %1555 = vperm.xlu0 %1962, %v1545_v11  }
0x1074   :  { %1560 = vperm.xlu0 %1962, %v1546_v12  }
0x1078   :  { %1565 = vperm.xlu0 %1962, %v1547_v14  }
0x10eb   :  { %v1551_v15 = vpop.permute.xlu0 %1550 }
0x10ec   :  { %v1568_v16 = vmul.f32 %v1551_v15, %v2624_v40  ;;  %v1613_v40 = vrot.slane %v1551_v15, %v2653_v31 }
0x10ee   :  { %v1572_v17 = vsel %vm1188_vm3, %v1568_v16, 0.0 }
0x10ef   :  { %v1573_v18 = vrot.slane %v1572_v17, 4  ;;  %v1556_v19 = vpop.permute.xlu0 %1555 }
0x10f0   :  { %v1569_v21 = vmul.f32 %v1556_v19, %v2626_v42  ;;  %v1617_v23 = vrot.slane %v1556_v19, %v2653_v31 }
0x10f1   :  { %v1574_v20 = vadd.f32 %v1573_v18, %v1572_v17 }
0x10f2   :  { %v1579_v22 = vsel %vm1188_vm3, %v1569_v21, 0.0  ;;  %v1626_v30 = vsel %vm1439_vm4, %v1617_v23, %v1613_v40 }
0x10f3   :  { %v1580_v34 = vrot.slane %v1579_v22, 4  ;;  %v1561_v1 = vpop.permute.xlu0 %1560  ;;  %v1575_v27 = vrot.slane %v1574_v20, 2 }
0x10f4   :  { %v1570_v24 = vmul.f32 %v1561_v1, %v2632_v45  ;;  %v1621_v26 = vrot.slane %v1561_v1, %v2653_v31 }
0x10f5   :  { %v1581_v2 = vadd.f32 %v1580_v34, %v1579_v22  ;;  %v1576_v39 = vadd.f32 %v1575_v27, %v1574_v20 }
0x10f6   :  { %v1586_v25 = vsel %vm1188_vm3, %v1570_v24, 0.0  ;;  %v1627_v36 = vsel %vm1441_vm5, %v1621_v26, %v1626_v30 }
0x10f7   :  { %v1582_v42 = vrot.slane %v1581_v2, 2  ;;  %v1587_v28 = vrot.slane %v1586_v25, 4  ;;  %v1566_v29 = vpop.permute.xlu0 %1565 }
0x10f8   :  { %v1571_v32 = vmul.f32 %v1566_v29, %v2636_v48  ;;  %v1625_v33 = vrot.slane %v1566_v29, %v2653_v31 }
0x10f9   :  { %v1583_v45 = vadd.f32 %v1582_v42, %v1581_v2  ;;  %v1588_v35 = vadd.f32 %v1587_v28, %v1586_v25 }
0x10fa   :  { %v1593_v37 = vsel %vm1188_vm3, %v1571_v32, 0.0  ;;  %v1628_v38 = vsel %vm1443_vm6, %v1625_v33, %v1627_v36 }
0x10fb   :  { %v1589_v41 = vrot.slane %v1588_v35, 2  ;;  %v1594_v43 = vrot.slane %v1593_v37, 4  ;;  %1630 = vst.msk [vmem:[#allocation19] sm:$0xf] %vm1446_vm7, %v1628_v38 }
0x10fc   :  { %2180 = shalt.err (!%p2177_p10)
}
0x10fd   :  { %s2181_s19 = scalar_lea.hbm %s2734_s16, 64 }
0x10fe   :  { %p2182_p11 = scmp.ne.s32.totalorder %s2734_s16, %s2181_s19  ;;  %p2185_p12 = scmp.lt.u32.totalorder %s2181_s19, %s2734_s16 }
0x1100   :  { %p2187_p13 = pnand %p2185_p12, %p2182_p11 }
0x1102   :  { %2190 = shalt.err (!%p2187_p13)
}
0x1103   :  { %1650 = dma.vmem_to_hbm [thread:$0]  %s1648_s13, 64, %s2734_s16, [#allocation20]   ;;  %v1584_v48 = vrot.slane %v1583_v45, 1  ;;  %v1590_v31 = vadd.f32 %v1589_v41, %v1588_v35  ;;  %v1595_v44 = vadd.f32 %v1594_v43, %v1593_v37  ;;  %v1577_v46 = vrot.slane %v1576_v39, 1 }
0x1104   :  { %s2241_s27 = smov [#allocation18]   ;;  %vm1608_vm8 = vcmask 519168  }
0x1105   :  { %v1591_v47 = vrot.slane %v1590_v31, 1  ;;  %v1596_v49 = vrot.slane %v1595_v44, 2  ;;  %v1585_v50 = vadd.f32 %v1584_v48, %v1583_v45  ;;  %v1578_v53 = vadd.f32 %v1577_v46, %v1576_v39  ;;  %s1637_s29 = sshll.u32 %s2241_s27, 4  ;;  %s1638_s29 = int_to_ptr.vmem [resolvable:$true] %s1637_s29 }
0x1106   :  { %s2191_s16 = scalar_lea.vmem %s1638_s29, 64  ;;  %p2196_p1 = scmp.lt.s32.totalorder %s1638_s29, %s1638_s29 }
0x1107   :  { %v1597_v51 = vadd.f32 %v1596_v49, %v1595_v44  ;;  %v1592_v52 = vadd.f32 %v1591_v47, %v1590_v31  ;;  %v1604_v58 = vsel %vm1439_vm4, %v1585_v50, %v1578_v53  ;;  %p2192_p0 = scmp.ne.s32.totalorder %s1638_s29, %s2191_s16  ;;  %p2197_p2 = scmp.lt.s32.totalorder %s2191_s16, %s2191_s16 }
0x1109   :  { %v1598_v54 = vrot.slane %v1597_v51, 1  ;;  %v1605_v59 = vsel %vm1441_vm5, %v1592_v52, %v1604_v58  ;;  %p2198_p3 = por %p2197_p2, %p2196_p1 }
0x110b   :  { %v1599_v56 = vadd.f32 %v1598_v54, %v1597_v51  ;;  %p2199_p4 = pnand %p2198_p3, %p2192_p0 }
0x110d   :  { %v1606_v60 = vsel %vm1443_vm6, %v1599_v56, %v1605_v59 }
0x110e   :  { %1609 = vst.msk [vmem:[#allocation18] sm:$0xf] %vm1608_vm8, %v1606_v60 }
0x110f   :  { %2202 = shalt.err (!%p2199_p4)
}
0x1110   :  { %s2203_s30 = scalar_lea.hbm %s2733_s15, 64 }
0x1111   :  { %p2204_p5 = scmp.ne.s32.totalorder %s2733_s15, %s2203_s30  ;;  %p2207_p6 = scmp.lt.u32.totalorder %s2203_s30, %s2733_s15 }
0x1113   :  { %p2209_p7 = pnand %p2207_p6, %p2204_p5 }
0x1115   :  { %2212 = shalt.err (!%p2209_p7)
}
0x1116   :  { %1640 = dma.vmem_to_hbm [thread:$0]  %s1638_s29, 64, %s2733_s15, [#allocation9]  }
0x1117   :  { %2221 = dma.done.wait [#allocation9], 64  }
0x1118   :  { %2222 = vsyncadd [#allocation9], 4294967232 }
0x1119   :  { %2223 = dma.done.wait [#allocation20], 64  }
0x111a   :  { %2224 = vsyncadd [#allocation20], 4294967232 }
0x111b   :  { %1657 = vsyncpa [#allocation8], 1 }
0x111c   :  { %1658 = vsyncpa [#allocation11], 1 }
0x111d   :  { %1659 = vsyncpa [#allocation14], 1 }
0x111e   :  { %1660 = vsyncpa [#allocation17], 1 }
0x111f   :  { %1661 = vsyncpa [#allocation9], 1 }
0x1120   :  { %1662 = vsyncpa [#allocation20], 1 }

</bundles_post_ra>
